<compile_context>
chip_gen: v6e
topology: v6e:2x2x1
jax: 0.10.0
libtpu: 0.0.40
codegen_flags: <defaults>
</compile_context>

<pallas_src>
import jax
import jax.numpy as jnp
from jax import lax
from jax.experimental import pallas as pl
from jax.experimental.pallas import tpu as pltpu


def convt_add_relu_kernel(cols_ref, w_ref, b_ref, x2_ref, out_ref):
    """One fused MXU matmul over the full (K*K*Cin) contraction + VPU epilogue."""
    acc = jnp.dot(cols_ref[...], w_ref[...], preferred_element_type=jnp.float32)
    out_ref[...] = jnp.maximum(acc + x2_ref[...] + b_ref[...], 0.0).astype(out_ref.dtype)


def _round_up(x, m):
    return ((x + m - 1) // m) * m


def model_forward(x1, x2, weight, bias, *, stride=2, pad=1, K=3):
    """Equivalent of: ReLU(ConvTranspose2d(x1) + x2). x1/x2 are NCHW."""
    N, Cin, H, W = x1.shape
    Cout = weight.shape[1]
    Ho = (H - 1) * stride - 2 * pad + K
    Wo = (W - 1) * stride - 2 * pad + K

    # --- glue (plain JAX): conv-transpose == stride-1 conv over the zero-dilated
    # input with flipped weights. Build a single fused im2col slab (P, K*K*Cin).
    # TODO(synk): replace the materialized im2col with a stride-2 sub-pixel (4-phase)
    # decomposition or halo-tiled input DMA to cut HBM traffic ~9x on large inputs.
    Hd, Wd = (H - 1) * stride + 1, (W - 1) * stride + 1
    xd = jnp.zeros((N, Cin, Hd, Wd), x1.dtype).at[:, :, ::stride, ::stride].set(x1)
    ep = K - 1 - pad                                    # effective padding = 1
    xp = jnp.pad(xd, ((0, 0), (0, 0), (ep, ep), (ep, ep)))
    xp = jnp.transpose(xp, (0, 2, 3, 1))                # NHWC (N, Hp, Wp, Cin)

    P = N * Ho * Wo
    KKC = K * K * Cin
    # im2col in (kh, kw, cin) order -> (P, K*K*Cin); bf16 halves the dominant byte stream.
    cols = jnp.concatenate(
        [xp[:, kh:kh + Ho, kw:kw + Wo, :].reshape(P, Cin)
         for kh in range(K) for kw in range(K)],
        axis=1).astype(jnp.bfloat16)                    # (P, KKC)

    # ConvTranspose weight (Cin, Cout, K, K) -> flipped, flattened (KKC, Cout),
    # matching the (kh, kw, cin) ordering of cols. Lane-pad Cout with zeros.
    Cout_pad = _round_up(Cout, 128)
    wk = jnp.transpose(weight[:, :, ::-1, ::-1], (2, 3, 0, 1)).reshape(KKC, Cout)
    wk = jnp.pad(wk, ((0, 0), (0, Cout_pad - Cout))).astype(jnp.bfloat16)
    b2 = jnp.pad(bias.reshape(1, Cout).astype(jnp.float32),
                 ((0, 0), (0, Cout_pad - Cout)))
    x2f = jnp.transpose(x2, (0, 2, 3, 1)).reshape(P, Cout).astype(jnp.float32)
    x2f = jnp.pad(x2f, ((0, 0), (0, Cout_pad - Cout)))

    # --- P tiling: big lane/sublane-dense tiles, auto double-buffered pipeline.
    # tile_P = 1024 keeps the working set well under the 32 MiB scoped VMEM default
    # (and v7x's 64 MiB physical VMEM); small inputs use one rounded-up tile.
    tile_P = 1024 if P >= 1024 else _round_up(P, 8)
    P_pad = _round_up(P, tile_P)
    if P_pad != P:
        cols = jnp.pad(cols, ((0, P_pad - P), (0, 0)))
        x2f = jnp.pad(x2f, ((0, P_pad - P), (0, 0)))

    grid = (P_pad // tile_P,)
    out_flat = pl.pallas_call(
        convt_add_relu_kernel,
        out_shape=jax.ShapeDtypeStruct((P_pad, Cout_pad), jnp.float32),
        grid=grid,
        in_specs=[
            pl.BlockSpec((tile_P, KKC), lambda i: (i, 0)),       # cols tile
            pl.BlockSpec((KKC, Cout_pad), lambda i: (0, 0)),     # weights (resident)
            pl.BlockSpec((1, Cout_pad), lambda i: (0, 0)),       # bias (resident)
            pl.BlockSpec((tile_P, Cout_pad), lambda i: (i, 0)),  # residual tile
        ],
        out_specs=pl.BlockSpec((tile_P, Cout_pad), lambda i: (i, 0)),
        compiler_params=pltpu.CompilerParams(
            dimension_semantics=("parallel",)),
    )(cols, wk, b2, x2f)

    out = out_flat[:P, :Cout].reshape(N, Ho, Wo, Cout)
    return jnp.transpose(out, (0, 3, 1, 2))                      # NCHW


if __name__ == "__main__":
    key = jax.random.PRNGKey(0)
    k1, k2, kw, kb = jax.random.split(key, 4)

    # Small shapes consistent with the module: Cin=100, Cout=200 (from __init__),
    # spatial scaled down from 224 -> 8 so x2 matches the conv-transpose output (15x15).
    N, Cin, Cout, H, W, K, stride, pad = 1, 100, 200, 8, 8, 3, 2, 1
    Ho = (H - 1) * stride - 2 * pad + K
    Wo = (W - 1) * stride - 2 * pad + K

    x1 = jax.random.normal(k1, (N, Cin, H, W), jnp.float32)
    x2 = jax.random.normal(k2, (N, Cout, Ho, Wo), jnp.float32)
    weight = jax.random.normal(kw, (Cin, Cout, K, K), jnp.float32) * 0.05
    bias = jax.random.normal(kb, (Cout,), jnp.float32) * 0.05

    out = jax.block_until_ready(model_forward(x1, x2, weight, bias))
    assert out.shape == (N, Cout, Ho, Wo)

    # Independent reference via XLA's dilated convolution (conv-transpose semantics).
    w_conv = jnp.transpose(weight[:, :, ::-1, ::-1], (1, 0, 2, 3))  # OIHW
    ref = lax.conv_general_dilated(
        x1, w_conv, window_strides=(1, 1), padding=[(pad, pad), (pad, pad)],
        lhs_dilation=(stride, stride), rhs_dilation=(1, 1),
        dimension_numbers=("NCHW", "OIHW", "NCHW"),
        precision=lax.Precision.HIGHEST)
    ref = jnp.maximum(ref + bias[None, :, None, None] + x2, 0.0)

    max_err = float(jnp.max(jnp.abs(out - ref)))
    assert bool(jnp.allclose(out, ref, rtol=2e-2, atol=2e-1)), max_err

    print("KERNEL_OK")
</pallas_src>

<mosaic_0001>
module attributes {stable_mosaic.version = 11 : i64} {
  func.func @convt_add_relu_kernel(%arg0: i32, %arg1: memref<232x900xbf16, #tpu.memory_space<vmem>>, %arg2: memref<900x256xbf16, #tpu.memory_space<vmem>>, %arg3: memref<1x256xf32, #tpu.memory_space<vmem>>, %arg4: memref<232x256xf32, #tpu.memory_space<vmem>>, %arg5: memref<232x256xf32, #tpu.memory_space<vmem>>) attributes {dimension_semantics = [#tpu.dimension_semantics<parallel>], iteration_bounds = array<i64: 1>, scalar_prefetch = 0 : i64, scratch_operands = 0 : i64, tpu.core_type = #tpu.core_type<tc>, window_params = [{transform_indices = @transform_0, window_bounds = array<i64: 232, 900>}, {pipeline_mode = #tpu.pipeline_mode<synchronous>, transform_indices = @transform_1, window_bounds = array<i64: 900, 256>}, {pipeline_mode = #tpu.pipeline_mode<synchronous>, transform_indices = @transform_2, window_bounds = array<i64: 1, 256>}, {transform_indices = @transform_3, window_bounds = array<i64: 232, 256>}, {transform_indices = @transform_4, window_bounds = array<i64: 232, 256>}]} {
    %c0 = arith.constant 0 : index
    %c0_0 = arith.constant 0 : index
    %0 = vector.load %arg1[%c0, %c0_0] : memref<232x900xbf16, #tpu.memory_space<vmem>>, vector<232x900xbf16>
    %c0_1 = arith.constant 0 : index
    %c0_2 = arith.constant 0 : index
    %1 = vector.load %arg2[%c0_1, %c0_2] : memref<900x256xbf16, #tpu.memory_space<vmem>>, vector<900x256xbf16>
    %cst = arith.constant dense<0.000000e+00> : vector<232x256xf32>
    %2 = tpu.matmul %0, %1, %cst {dimension_numbers = #tpu.dot_dimension_numbers<[1], [0], [0], [1], [0, 0, 1, 1], [], []>} : vector<232x900xbf16>, vector<900x256xbf16>, vector<232x256xf32> -> vector<232x256xf32>
    %c0_3 = arith.constant 0 : index
    %c0_4 = arith.constant 0 : index
    %3 = vector.load %arg4[%c0_3, %c0_4] : memref<232x256xf32, #tpu.memory_space<vmem>>, vector<232x256xf32>
    %4 = arith.addf %2, %3 : vector<232x256xf32>
    %c0_5 = arith.constant 0 : index
    %c0_6 = arith.constant 0 : index
    %5 = vector.load %arg3[%c0_5, %c0_6] : memref<1x256xf32, #tpu.memory_space<vmem>>, vector<1x256xf32>
    %6 = vector.broadcast %5 : vector<1x256xf32> to vector<232x256xf32>
    %7 = arith.addf %4, %6 : vector<232x256xf32>
    %cst_7 = arith.constant 0.000000e+00 : f32
    %8 = vector.broadcast %cst_7 : f32 to vector<232x256xf32>
    %9 = arith.maximumf %7, %8 : vector<232x256xf32>
    %c0_8 = arith.constant 0 : index
    %c0_9 = arith.constant 0 : index
    %10 = vector.load %arg5[%c0_8, %c0_9] : memref<232x256xf32, #tpu.memory_space<vmem>>, vector<232x256xf32>
    tpu.vector_store %arg5[%c0_8, %c0_9], %9 {strides = array<i32>} : memref<232x256xf32, #tpu.memory_space<vmem>>, vector<232x256xf32>,
    return
  }
  func.func @transform_0(%arg0: i32) -> (i32, i32) {
    %c0_i32 = arith.constant 0 : i32
    %c0_i32_0 = arith.constant 0 : i32
    return %arg0, %c0_i32 : i32, i32
  }
  func.func @transform_1(%arg0: i32) -> (i32, i32) {
    %c0_i32 = arith.constant 0 : i32
    %c0_i32_0 = arith.constant 0 : i32
    %c0_i32_1 = arith.constant 0 : i32
    return %c0_i32, %c0_i32_0 : i32, i32
  }
  func.func @transform_2(%arg0: i32) -> (i32, i32) {
    %c0_i32 = arith.constant 0 : i32
    %c0_i32_0 = arith.constant 0 : i32
    %c0_i32_1 = arith.constant 0 : i32
    return %c0_i32, %c0_i32_0 : i32, i32
  }
  func.func @transform_3(%arg0: i32) -> (i32, i32) {
    %c0_i32 = arith.constant 0 : i32
    %c0_i32_0 = arith.constant 0 : i32
    return %arg0, %c0_i32 : i32, i32
  }
  func.func @transform_4(%arg0: i32) -> (i32, i32) {
    %c0_i32 = arith.constant 0 : i32
    %c0_i32_0 = arith.constant 0 : i32
    return %arg0, %c0_i32 : i32, i32
  }
}

</mosaic_0001>

<bundles_post_ra>
// kernel: tpu_custom_call.1
= control target key start
LH: loop header
LB: loop body
LE: loop exit
PB: predicated region body
PF: predicated region fallthrough
CT: control target
= control target key end

     0   :  { %vm1490_vm0 = vcmask 1041408   ;;  %s4026_s0 = inlined_call_operand.vmem [shape: bf16[232,900], index: 0, kind: input, shape index: {}]   ;;  %s4027_s1 = inlined_call_operand.vmem [shape: bf16[900,256], index: 1, kind: input, shape index: {}]   ;;  %s4028_s2 = inlined_call_operand.vmem [shape: f32[1,256], index: 2, kind: input, shape index: {}]   ;;  %s4029_s3 = inlined_call_operand.vmem [shape: f32[232,256], index: 3, kind: input, shape index: {}]   ;;  %s4030_s4 = inlined_call_operand.hbm [shape: f32[232,256], index: 4, kind: output, shape index: {}]  }
   0x1   :  { %v2676_v0 = vld [vmem:[%s4027_s1 + $0x74] ss:$8 sps:$4 sm:$0xff]   ;;  %v2680_v2 = vld [vmem:[%s4027_s1 + $0x70] ss:$8 sps:$4 sm:$0xff]   ;;  %v2682_v4 = vld [vmem:[%s4027_s1 + $0x64] ss:$8 sps:$4 sm:$0xff]  }
   0x2   :  { %v2678_v1 = vld [vmem:[%s4027_s1 + $0x174] ss:$8 sps:$4 sm:$0xff]   ;;  %1497 = vmatprep.subr.bf16.mxu0 %v2676_v0  ;;  %v2681_v3 = vld [vmem:[%s4027_s1 + $0x170] ss:$8 sps:$4 sm:$0xff]   ;;  %v2684_v5 = vld [vmem:[%s4027_s1 + $0x164] ss:$8 sps:$4 sm:$0xff]  }
   0x3   :  { %1678 = vmatprep.subr.bf16.mxu1 %v2678_v1  ;;  %1498 = vmatpush1.bf16.msra.mxu0 %v2680_v2  ;;  %v2686_v6 = vld [vmem:[%s4027_s1 + $0x60] ss:$8 sps:$4 sm:$0xff]   ;;  %v2688_v8 = vld [vmem:[%s4027_s1 + $0x54] ss:$8 sps:$4 sm:$0xff]   ;;  %v2692_v10 = vld [vmem:[%s4027_s1 + $0x50] ss:$8 sps:$4 sm:$0xff]  }
   0x4   :  { %1679 = vmatpush1.bf16.msra.mxu1 %v2681_v3  ;;  %1499 = vmatprep.subr.bf16.mxu0 %v2682_v4  ;;  %v2687_v7 = vld [vmem:[%s4027_s1 + $0x160] ss:$8 sps:$4 sm:$0xff]   ;;  %v2690_v9 = vld [vmem:[%s4027_s1 + $0x154] ss:$8 sps:$4 sm:$0xff]   ;;  %v2693_v11 = vld [vmem:[%s4027_s1 + $0x150] ss:$8 sps:$4 sm:$0xff]  }
   0x5   :  { %1680 = vmatprep.subr.bf16.mxu1 %v2684_v5  ;;  %v2694_v12 = vld [vmem:[%s4027_s1 + $0x44] ss:$8 sps:$4 sm:$0xff]   ;;  %v2698_v14 = vld [vmem:[%s4027_s1 + $0x40] ss:$8 sps:$4 sm:$0xff]   ;;  %v2700_v16 = vld [vmem:[%s4027_s1 + $0x34] ss:$8 sps:$4 sm:$0xff]  }
   0x6   :  { %v2696_v13 = vld [vmem:[%s4027_s1 + $0x144] ss:$8 sps:$4 sm:$0xff]   ;;  %v2699_v15 = vld [vmem:[%s4027_s1 + $0x140] ss:$8 sps:$4 sm:$0xff]   ;;  %v2702_v17 = vld [vmem:[%s4027_s1 + $0x134] ss:$8 sps:$4 sm:$0xff]  }
   0x7   :  { %1500 = vmatpush1.bf16.msra.mxu0 %v2686_v6  ;;  %v2704_v18 = vld [vmem:[%s4027_s1 + $0x30] ss:$8 sps:$4 sm:$0xff]   ;;  %v2706_v20 = vld [vmem:[%s4027_s1 + $0x24] ss:$8 sps:$4 sm:$0xff]   ;;  %v2710_v22 = vld [vmem:[%s4027_s1 + $0x20] ss:$8 sps:$4 sm:$0xff]  }
   0x8   :  { %1681 = vmatpush1.bf16.msra.mxu1 %v2687_v7  ;;  %1501 = vmatprep.subr.bf16.mxu0 %v2688_v8  ;;  %v2705_v19 = vld [vmem:[%s4027_s1 + $0x130] ss:$8 sps:$4 sm:$0xff]   ;;  %v2708_v21 = vld [vmem:[%s4027_s1 + $0x124] ss:$8 sps:$4 sm:$0xff]   ;;  %v2711_v23 = vld [vmem:[%s4027_s1 + $0x120] ss:$8 sps:$4 sm:$0xff]  }
   0x9   :  { %1682 = vmatprep.subr.bf16.mxu1 %v2690_v9  ;;  %v2712_v24 = vld [vmem:[%s4027_s1 + $0x14] ss:$8 sps:$4 sm:$0xff]   ;;  %v2716_v26 = vld [vmem:[%s4027_s1 + $0x10] ss:$8 sps:$4 sm:$0xff]   ;;  %v2718_v28 = vld [vmem:[%s4027_s1 + $0x4] ss:$8 sps:$4 sm:$0xff]  }
   0xa   :  { %v2714_v25 = vld [vmem:[%s4027_s1 + $0x114] ss:$8 sps:$4 sm:$0xff]   ;;  %v2717_v27 = vld [vmem:[%s4027_s1 + $0x110] ss:$8 sps:$4 sm:$0xff]   ;;  %v2720_v29 = vld [vmem:[%s4027_s1 + $0x104] ss:$8 sps:$4 sm:$0xff]  }
   0xb   :  { %1502 = vmatpush1.bf16.msra.mxu0 %v2692_v10  ;;  %v2722_v30 = vld [vmem:[%s4027_s1] ss:$8 sps:$4 sm:$0xff]   ;;  %v2724_v32 = vld [vmem:[%s4027_s1 + $0xf4] ss:$8 sps:$4 sm:$0xff]   ;;  %v2728_v34 = vld [vmem:[%s4027_s1 + $0xf0] ss:$8 sps:$4 sm:$0xff]  }
   0xc   :  { %1683 = vmatpush1.bf16.msra.mxu1 %v2693_v11  ;;  %1503 = vmatprep.subr.bf16.mxu0 %v2694_v12  ;;  %v2723_v31 = vld [vmem:[%s4027_s1 + $0x100] ss:$8 sps:$4 sm:$0xff]   ;;  %v2726_v33 = vld [vmem:[%s4027_s1 + $0x1f4] ss:$8 sps:$4 sm:$0xff]   ;;  %v2729_v35 = vld [vmem:[%s4027_s1 + $0x1f0] ss:$8 sps:$4 sm:$0xff]  }
   0xd   :  { %1684 = vmatprep.subr.bf16.mxu1 %v2696_v13  ;;  %v2730_v36 = vld [vmem:[%s4027_s1 + $0xe4] ss:$8 sps:$4 sm:$0xff]   ;;  %v2734_v38 = vld [vmem:[%s4027_s1 + $0xe0] ss:$8 sps:$4 sm:$0xff]   ;;  %v2736_v40 = vld [vmem:[%s4027_s1 + $0xd4] ss:$8 sps:$4 sm:$0xff]  }
   0xe   :  { %v2732_v37 = vld [vmem:[%s4027_s1 + $0x1e4] ss:$8 sps:$4 sm:$0xff]   ;;  %v2735_v39 = vld [vmem:[%s4027_s1 + $0x1e0] ss:$8 sps:$4 sm:$0xff]   ;;  %v2738_v41 = vld [vmem:[%s4027_s1 + $0x1d4] ss:$8 sps:$4 sm:$0xff]  }
   0xf   :  { %1504 = vmatpush1.bf16.msra.mxu0 %v2698_v14  ;;  %v2740_v42 = vld [vmem:[%s4027_s1 + $0xd0] ss:$8 sps:$4 sm:$0xff]   ;;  %v2742_v44 = vld [vmem:[%s4027_s1 + $0xc4] ss:$8 sps:$4 sm:$0xff]   ;;  %v2746_v46 = vld [vmem:[%s4027_s1 + $0xc0] ss:$8 sps:$4 sm:$0xff]  }
  0x10   :  { %1685 = vmatpush1.bf16.msra.mxu1 %v2699_v15  ;;  %1505 = vmatprep.subr.bf16.mxu0 %v2700_v16  ;;  %v2741_v43 = vld [vmem:[%s4027_s1 + $0x1d0] ss:$8 sps:$4 sm:$0xff]   ;;  %v2744_v45 = vld [vmem:[%s4027_s1 + $0x1c4] ss:$8 sps:$4 sm:$0xff]   ;;  %v2747_v47 = vld [vmem:[%s4027_s1 + $0x1c0] ss:$8 sps:$4 sm:$0xff]  }
  0x11   :  { %1686 = vmatprep.subr.bf16.mxu1 %v2702_v17  ;;  %v3051_v48 = vld [vmem:[%s4026_s0] sm:$0xff]  ;;  %v20_v50 = vld [vmem:[%s4026_s0 + $0x8] sm:$0xff]  ;;  %v2748_v52 = vld [vmem:[%s4027_s1 + $0xb4] ss:$8 sps:$4 sm:$0xff]  }
  0x12   :  { %v23_v49 = vld [vmem:[%s4026_s0 + $0x20] sm:$0xff]  ;;  %v24_v51 = vld [vmem:[%s4026_s0 + $0x28] sm:$0xff]  ;;  %v2750_v54 = vld [vmem:[%s4027_s1 + $0x1b4] ss:$8 sps:$4 sm:$0xff]  }
  0x13   :  { %1506 = vmatpush1.bf16.msra.mxu0 %v2704_v18  ;;  %v2424_v53 = vcombine.high %v3051_v48, %v23_v49  ;;  %v2426_v55 = vcombine.high %v20_v50, %v24_v51  ;;  %v2752_v56 = vld [vmem:[%s4027_s1 + $0xb0] ss:$8 sps:$4 sm:$0xff]   ;;  %v2754_v58 = vld [vmem:[%s4027_s1 + $0xa4] ss:$8 sps:$4 sm:$0xff]   ;;  %v2758_v60 = vld [vmem:[%s4027_s1 + $0xa0] ss:$8 sps:$4 sm:$0xff]   ;;  %v2423_v12 = vcombine.low %v3051_v48, %v23_v49  ;;  %v2425_v13 = vcombine.low %v20_v50, %v24_v51 }
  0x14   :  { %1687 = vmatpush1.bf16.msra.mxu1 %v2705_v19  ;;  %1507 = vmatprep.subr.bf16.mxu0 %v2706_v20  ;;  %v2753_v57 = vld [vmem:[%s4027_s1 + $0x1b0] ss:$8 sps:$4 sm:$0xff]   ;;  %v2756_v59 = vld [vmem:[%s4027_s1 + $0x1a4] ss:$8 sps:$4 sm:$0xff]   ;;  %v2759_v61 = vld [vmem:[%s4027_s1 + $0x1a0] ss:$8 sps:$4 sm:$0xff]  }
  0x15   :  { %1688 = vmatprep.subr.bf16.mxu1 %v2708_v21  ;;  %1529 = vmatprep.mubr.bf16.mxu0 %v2424_v53  ;;  %v2760_v62 = vld [vmem:[%s4027_s1 + $0x94] ss:$8 sps:$4 sm:$0xff]   ;;  %v2764_v0 = vld [vmem:[%s4027_s1 + $0x90] ss:$8 sps:$4 sm:$0xff]   ;;  %v2766_v2 = vld [vmem:[%s4027_s1 + $0x84] ss:$8 sps:$4 sm:$0xff]  }
  0x16   :  { %1710 = vmatprep.mubr.bf16.mxu1 %v2426_v55  ;;  %v2762_v63 = vld [vmem:[%s4027_s1 + $0x194] ss:$8 sps:$4 sm:$0xff]   ;;  %v2765_v1 = vld [vmem:[%s4027_s1 + $0x190] ss:$8 sps:$4 sm:$0xff]   ;;  %v2768_v3 = vld [vmem:[%s4027_s1 + $0x184] ss:$8 sps:$4 sm:$0xff]  }
  0x17   :  { %1508 = vmatpush1.bf16.msra.mxu0 %v2710_v22  ;;  %v2770_v4 = vld [vmem:[%s4027_s1 + $0x80] ss:$8 sps:$4 sm:$0xff]   ;;  %v2774_v6 = vld [vmem:[%s4027_s1 + $0x274] ss:$8 sps:$4 sm:$0xff]   ;;  %v2772_v14 = vld [vmem:[%s4027_s1 + $0x270] ss:$8 sps:$4 sm:$0xff]  }
  0x18   :  { %1689 = vmatpush1.bf16.msra.mxu1 %v2711_v23  ;;  %1509 = vmatprep.subr.bf16.mxu0 %v2712_v24  ;;  %v2771_v5 = vld [vmem:[%s4027_s1 + $0x180] ss:$8 sps:$4 sm:$0xff]   ;;  %v2777_v7 = vld [vmem:[%s4027_s1 + $0x374] ss:$8 sps:$4 sm:$0xff]   ;;  %v2775_v15 = vld [vmem:[%s4027_s1 + $0x370] ss:$8 sps:$4 sm:$0xff]  }
  0x19   :  { %1690 = vmatprep.subr.bf16.mxu1 %v2714_v25  ;;  %v27_v8 = vld [vmem:[%s4026_s0 + $0x40] sm:$0xff]  ;;  %v28_v10 = vld [vmem:[%s4026_s0 + $0x48] sm:$0xff]  ;;  %v2783_v25 = vld [vmem:[%s4027_s1 + $0x254] ss:$8 sps:$4 sm:$0xff]  }
  0x1a   :  { %v31_v9 = vld [vmem:[%s4026_s0 + $0x60] sm:$0xff]  ;;  %v32_v11 = vld [vmem:[%s4026_s0 + $0x68] sm:$0xff]  ;;  %v2793_v48 = vld [vmem:[%s4027_s1 + $0x230] ss:$8 sps:$4 sm:$0xff]  }
  0x1b   :  { %1510 = vmatpush1.bf16.msra.mxu0 %v2716_v26  ;;  %v2432_v16 = vcombine.high %v27_v8, %v31_v9  ;;  %v2434_v17 = vcombine.high %v28_v10, %v32_v11  ;;  %v2778_v18 = vld [vmem:[%s4027_s1 + $0x260] ss:$8 sps:$4 sm:$0xff]   ;;  %v2780_v19 = vld [vmem:[%s4027_s1 + $0x264] ss:$8 sps:$4 sm:$0xff]   ;;  %v2808_v49 = vld [vmem:[%s4027_s1 + $0x330] ss:$8 sps:$4 sm:$0xff]  }
  0x1c   :  { %1691 = vmatpush1.bf16.msra.mxu1 %v2717_v27  ;;  %1511 = vmatprep.subr.bf16.mxu0 %v2718_v28  ;;  %v2786_v20 = vld [vmem:[%s4027_s1 + $0x364] ss:$8 sps:$4 sm:$0xff]   ;;  %v2784_v26 = vld [vmem:[%s4027_s1 + $0x360] ss:$8 sps:$4 sm:$0xff]   ;;  %v2792_v27 = vld [vmem:[%s4027_s1 + $0x354] ss:$8 sps:$4 sm:$0xff]   ;;  %v2431_v28 = vcombine.low %v27_v8, %v31_v9 }
  0x1d   :  { %1692 = vmatprep.subr.bf16.mxu1 %v2720_v29  ;;  %v35_v21 = vld [vmem:[%s4026_s0 + $0x80] sm:$0xff]  ;;  %v36_v23 = vld [vmem:[%s4026_s0 + $0x88] sm:$0xff]  ;;  %v2433_v29 = vcombine.low %v28_v10, %v32_v11  ;;  %v2813_v11 = vld [vmem:[%s4027_s1 + $0x2f4] ss:$8 sps:$4 sm:$0xff]  }
  0x1e   :  { %v39_v22 = vld [vmem:[%s4026_s0 + $0xa0] sm:$0xff]  ;;  %v40_v24 = vld [vmem:[%s4026_s0 + $0xa8] sm:$0xff] }
  0x1f   :  { %1512 = vmatpush1.bf16.msra.mxu0 %v2722_v30  ;;  %v2440_v30 = vcombine.high %v35_v21, %v39_v22  ;;  %v2798_v50 = vld [vmem:[%s4027_s1 + $0x224] ss:$8 sps:$4 sm:$0xff]   ;;  %v2805_v8 = vld [vmem:[%s4027_s1 + $0x200] ss:$8 sps:$4 sm:$0xff]  }
  0x20   :  { %1693 = vmatpush1.bf16.msra.mxu1 %v2723_v31  ;;  %1513 = vmatprep.subr.bf16.mxu0 %v2724_v32  ;;  %v2442_v31 = vcombine.high %v36_v23, %v40_v24  ;;  %v2781_v32 = vld [vmem:[%s4027_s1 + $0x250] ss:$8 sps:$4 sm:$0xff]   ;;  %v2819_v51 = vld [vmem:[%s4027_s1 + $0x324] ss:$8 sps:$4 sm:$0xff]   ;;  %v2832_v10 = vld [vmem:[%s4027_s1 + $0x300] ss:$8 sps:$4 sm:$0xff]  }
  0x21   :  { %1694 = vmatprep.subr.bf16.mxu1 %v2726_v33  ;;  %v2790_v33 = vld [vmem:[%s4027_s1 + $0x350] ss:$8 sps:$4 sm:$0xff]   ;;  %v55_v53 = vld [vmem:[%s4026_s0 + $0x120] sm:$0xff]  ;;  %v56_v55 = vld [vmem:[%s4026_s0 + $0x128] sm:$0xff] }
  0x22   :  { %v247_v9 = vld [vmem:[%s4027_s1 + $0x380] sm:$0x33] }
  0x23   :  { %1514 = vmatpush2.bf16.msra.mxu0 %v2728_v34  ;;  %v2789_v34 = vld [vmem:[%s4027_s1 + $0x244] ss:$8 sps:$4 sm:$0xff]  }
  0x24   :  { %1695 = vmatpush2.bf16.msra.mxu1 %v2729_v35  ;;  %1515 = vmatprep.subr.bf16.mxu0 %v2730_v36  ;;  %v2801_v35 = vld [vmem:[%s4027_s1 + $0x344] ss:$8 sps:$4 sm:$0xff]  }
  0x25   :  { %1696 = vmatprep.subr.bf16.mxu1 %v2732_v37  ;;  %v43_v36 = vld [vmem:[%s4026_s0 + $0xc0] sm:$0xff] }
  0x26   :  { %v47_v37 = vld [vmem:[%s4026_s0 + $0xe0] sm:$0xff] }
  0x27   :  { %1516 = vmatpush2.bf16.msra.mxu0 %v2734_v38  ;;  %v44_v38 = vld [vmem:[%s4026_s0 + $0xc8] sm:$0xff] }
  0x28   :  { %1697 = vmatpush2.bf16.msra.mxu1 %v2735_v39  ;;  %1517 = vmatprep.subr.bf16.mxu0 %v2736_v40  ;;  %v48_v39 = vld [vmem:[%s4026_s0 + $0xe8] sm:$0xff] }
  0x29   :  { %1698 = vmatprep.subr.bf16.mxu1 %v2738_v41  ;;  %v2787_v40 = vld [vmem:[%s4027_s1 + $0x240] ss:$8 sps:$4 sm:$0xff]  }
  0x2a   :  { %v2799_v41 = vld [vmem:[%s4027_s1 + $0x340] ss:$8 sps:$4 sm:$0xff]  }
  0x2b   :  { %1518 = vmatpush2.bf16.msra.mxu0 %v2740_v42  ;;  %v2795_v42 = vld [vmem:[%s4027_s1 + $0x234] ss:$8 sps:$4 sm:$0xff]  }
  0x2c   :  { %1699 = vmatpush2.bf16.msra.mxu1 %v2741_v43  ;;  %1519 = vmatprep.subr.bf16.mxu0 %v2742_v44  ;;  %v2810_v43 = vld [vmem:[%s4027_s1 + $0x334] ss:$8 sps:$4 sm:$0xff]   ;;  %v2439_v44 = vcombine.low %v35_v21, %v39_v22  ;;  %v67_v21 = vld [vmem:[%s4026_s0 + $0x180] sm:$0xff] }
  0x2d   :  { %1700 = vmatprep.subr.bf16.mxu1 %v2744_v45  ;;  %v2441_v45 = vcombine.low %v36_v23, %v40_v24  ;;  %v71_v22 = vld [vmem:[%s4026_s0 + $0x1a0] sm:$0xff]  ;;  %v68_v23 = vld [vmem:[%s4026_s0 + $0x188] sm:$0xff] }
  0x2e   :  { %v72_v24 = vld [vmem:[%s4026_s0 + $0x1a8] sm:$0xff] }
  0x2f   :  { %1520 = vmatpush2.bf16.msra.mxu0 %v2746_v46  ;;  %v2448_v46 = vcombine.high %v43_v36, %v47_v37 }
  0x30   :  { %1701 = vmatpush2.bf16.msra.mxu1 %v2747_v47  ;;  %1521 = vmatprep.subr.bf16.mxu0 %v2748_v52  ;;  %v2450_v47 = vcombine.high %v44_v38, %v48_v39  ;;  %v51_v52 = vld [vmem:[%s4026_s0 + $0x100] sm:$0xff] }
  0x31   :  { %1702 = vmatprep.subr.bf16.mxu1 %v2750_v54  ;;  %v52_v54 = vld [vmem:[%s4026_s0 + $0x108] sm:$0xff] }
  0x33   :  { %1522 = vmatpush2.bf16.msra.mxu0 %v2752_v56  ;;  %v2796_v56 = vld [vmem:[%s4027_s1 + $0x220] ss:$8 sps:$4 sm:$0xff]  }
  0x34   :  { %1703 = vmatpush2.bf16.msra.mxu1 %v2753_v57  ;;  %1523 = vmatprep.subr.bf16.mxu0 %v2754_v58  ;;  %v2817_v57 = vld [vmem:[%s4027_s1 + $0x320] ss:$8 sps:$4 sm:$0xff]   ;;  %v2804_v58 = vld [vmem:[%s4027_s1 + $0x214] ss:$8 sps:$4 sm:$0xff]  }
  0x35   :  { %1704 = vmatprep.subr.bf16.mxu1 %v2756_v59  ;;  %v2825_v59 = vld [vmem:[%s4027_s1 + $0x314] ss:$8 sps:$4 sm:$0xff]  }
  0x37   :  { %1524 = vmatpush2.bf16.msra.mxu0 %v2758_v60  ;;  %v2447_v60 = vcombine.low %v43_v36, %v47_v37 }
  0x38   :  { %1705 = vmatpush2.bf16.msra.mxu1 %v2759_v61  ;;  %1525 = vmatprep.subr.bf16.mxu0 %v2760_v62  ;;  %v2449_v61 = vcombine.low %v44_v38, %v48_v39  ;;  %v2456_v62 = vcombine.high %v51_v52, %v55_v53 }
  0x39   :  { %1706 = vmatprep.subr.bf16.mxu1 %v2762_v63  ;;  %v2458_v63 = vcombine.high %v52_v54, %v56_v55 }
  0x3b   :  { %1526 = vmatpush2.bf16.msra.mxu0 %v2764_v0  ;;  %v2802_v0 = vld [vmem:[%s4027_s1 + $0x210] ss:$8 sps:$4 sm:$0xff]  }
  0x3c   :  { %1707 = vmatpush2.bf16.msra.mxu1 %v2765_v1  ;;  %1527 = vmatprep.subr.bf16.mxu0 %v2766_v2  ;;  %v2823_v1 = vld [vmem:[%s4027_s1 + $0x310] ss:$8 sps:$4 sm:$0xff]   ;;  %v2807_v2 = vld [vmem:[%s4027_s1 + $0x204] ss:$8 sps:$4 sm:$0xff]  }
  0x3d   :  { %1708 = vmatprep.subr.bf16.mxu1 %v2768_v3  ;;  %v2834_v3 = vld [vmem:[%s4027_s1 + $0x304] ss:$8 sps:$4 sm:$0xff]  }
  0x3f   :  { %1528 = vmatpush2.bf16.msra.mxu0 %v2770_v4  ;;  %v59_v4 = vld [vmem:[%s4026_s0 + $0x140] sm:$0xff] }
  0x40   :  { %1709 = vmatpush2.bf16.msra.mxu1 %v2771_v5  ;;  %1859 = vmatprep.subr.bf16.mxu0 %v2774_v6  ;;  %v63_v5 = vld [vmem:[%s4026_s0 + $0x160] sm:$0xff]  ;;  %v60_v6 = vld [vmem:[%s4026_s0 + $0x148] sm:$0xff] }
  0x41   :  { %2040 = vmatprep.subr.bf16.mxu1 %v2777_v7  ;;  %v64_v7 = vld [vmem:[%s4026_s0 + $0x168] sm:$0xff] }
  0x42   :  { %1530 = vmatmul.mubr.bf16.vlgmr.msra.gmra.mxu0 %v2423_v12  ;;  %v2656_v12 = vcombine.high %v247_v9, %v247_v9 }
  0x43   :  { %1711 = vmatmul.mubr.bf16.vlgmr.msra.gmra.mxu1 %v2425_v13  ;;  %1860 = vmatpush1.bf16.msra.mxu0 %v2772_v14  ;;  %v2655_v13 = vcombine.low %v247_v9, %v247_v9  ;;  %v2455_v14 = vcombine.low %v51_v52, %v55_v53 }
  0x44   :  { %2041 = vmatpush1.bf16.msra.mxu1 %v2775_v15  ;;  %1539 = vmatprep.mubr.bf16.mxu0 %v2432_v16  ;;  %v2457_v15 = vcombine.low %v52_v54, %v56_v55  ;;  %v2464_v16 = vcombine.high %v59_v4, %v63_v5 }
  0x45   :  { %1720 = vmatprep.mubr.bf16.mxu1 %v2434_v17  ;;  %1861 = vmatprep.subr.bf16.mxu0 %v2780_v19  ;;  %v2466_v17 = vcombine.high %v60_v6, %v64_v7  ;;  %v2816_v19 = vld [vmem:[%s4027_s1 + $0x2e4] ss:$8 sps:$4 sm:$0xff]  }
  0x46   :  { %2042 = vmatprep.subr.bf16.mxu1 %v2786_v20  ;;  %v1492_v20 = vsel %vm1490_vm0, %v2655_v13, 0 }
  0x47   :  { %1862 = vmatpush1.bf16.msra.mxu0 %v2778_v18  ;;  %v2811_v18 = vld [vmem:[%s4027_s1 + $0x2f0] ss:$8 sps:$4 sm:$0xff]  }
  0x48   :  { %2043 = vmatpush1.bf16.msra.mxu1 %v2784_v26  ;;  %1863 = vmatprep.subr.bf16.mxu0 %v2783_v25  ;;  %v2814_v25 = vld [vmem:[%s4027_s1 + $0x2e0] ss:$8 sps:$4 sm:$0xff]   ;;  %v2822_v26 = vld [vmem:[%s4027_s1 + $0x2d4] ss:$8 sps:$4 sm:$0xff]  }
  0x49   :  { %2044 = vmatprep.subr.bf16.mxu1 %v2792_v27  ;;  %v2463_v27 = vcombine.low %v59_v4, %v63_v5 }
  0x4a   :  { %1540 = vmatmul.mubr.bf16.gmra.mxu0 %v2431_v28  ;;  %v2465_v28 = vcombine.low %v60_v6, %v64_v7 }
  0x4b   :  { %1721 = vmatmul.mubr.bf16.gmra.mxu1 %v2433_v29  ;;  %1549 = vmatprep.mubr.bf16.mxu0 %v2440_v30 }
  0x4c   :  { %1730 = vmatprep.mubr.bf16.mxu1 %v2442_v31  ;;  %1864 = vmatpush1.bf16.msra.mxu0 %v2781_v32 }
  0x4d   :  { %2045 = vmatpush1.bf16.msra.mxu1 %v2790_v33  ;;  %1865 = vmatprep.subr.bf16.mxu0 %v2789_v34 }
  0x4e   :  { %2046 = vmatprep.subr.bf16.mxu1 %v2801_v35 }
  0x50   :  { %1866 = vmatpush1.bf16.msra.mxu0 %v2787_v40 }
  0x51   :  { %2047 = vmatpush1.bf16.msra.mxu1 %v2799_v41  ;;  %1867 = vmatprep.subr.bf16.mxu0 %v2795_v42 }
  0x52   :  { %2048 = vmatprep.subr.bf16.mxu1 %v2810_v43  ;;  %1550 = vmatmul.mubr.bf16.gmra.mxu0 %v2439_v44 }
  0x53   :  { %1731 = vmatmul.mubr.bf16.gmra.mxu1 %v2441_v45  ;;  %1559 = vmatprep.mubr.bf16.mxu0 %v2448_v46 }
  0x54   :  { %1740 = vmatprep.mubr.bf16.mxu1 %v2450_v47  ;;  %1868 = vmatpush1.bf16.msra.mxu0 %v2793_v48 }
  0x55   :  { %2049 = vmatpush1.bf16.msra.mxu1 %v2808_v49  ;;  %1869 = vmatprep.subr.bf16.mxu0 %v2798_v50 }
  0x56   :  { %2050 = vmatprep.subr.bf16.mxu1 %v2819_v51 }
  0x58   :  { %1870 = vmatpush1.bf16.msra.mxu0 %v2796_v56 }
  0x59   :  { %2051 = vmatpush1.bf16.msra.mxu1 %v2817_v57  ;;  %1871 = vmatprep.subr.bf16.mxu0 %v2804_v58 }
  0x5a   :  { %2052 = vmatprep.subr.bf16.mxu1 %v2825_v59  ;;  %1560 = vmatmul.mubr.bf16.gmra.mxu0 %v2447_v60 }
  0x5b   :  { %1741 = vmatmul.mubr.bf16.gmra.mxu1 %v2449_v61  ;;  %1569 = vmatprep.mubr.bf16.mxu0 %v2456_v62 }
  0x5c   :  { %1750 = vmatprep.mubr.bf16.mxu1 %v2458_v63  ;;  %1872 = vmatpush1.bf16.msra.mxu0 %v2802_v0 }
  0x5d   :  { %2053 = vmatpush1.bf16.msra.mxu1 %v2823_v1  ;;  %1873 = vmatprep.subr.bf16.mxu0 %v2807_v2 }
  0x5e   :  { %2054 = vmatprep.subr.bf16.mxu1 %v2834_v3 }
  0x60   :  { %1874 = vmatpush1.bf16.msra.mxu0 %v2805_v8 }
  0x61   :  { %2055 = vmatpush1.bf16.msra.mxu1 %v2832_v10  ;;  %1875 = vmatprep.subr.bf16.mxu0 %v2813_v11 }
  0x62   :  { %2657 = vmatprep.subr.msk.bf16.mxu1 %vm1490_vm0, %v2656_v12  ;;  %1570 = vmatmul.mubr.bf16.gmra.mxu0 %v2455_v14 }
  0x63   :  { %1751 = vmatmul.mubr.bf16.gmra.mxu1 %v2457_v15  ;;  %1579 = vmatprep.mubr.bf16.mxu0 %v2464_v16 }
  0x64   :  { %1760 = vmatprep.mubr.bf16.mxu1 %v2466_v17  ;;  %1876 = vmatpush2.bf16.msra.mxu0 %v2811_v18 }
  0x65   :  { %2071 = vmatpush2.bf16.msra.mxu1 %v1492_v20  ;;  %1877 = vmatprep.subr.bf16.mxu0 %v2816_v19 }
  0x66   :  { %9 = vsyncpa [#allocation3], 0  ;;  %v2472_v29 = vcombine.high %v67_v21, %v71_v22  ;;  %v2474_v30 = vcombine.high %v68_v23, %v72_v24  ;;  %v2820_v31 = vld [vmem:[%s4027_s1 + $0x2d0] ss:$8 sps:$4 sm:$0xff]   ;;  %v2828_v32 = vld [vmem:[%s4027_s1 + $0x2c4] ss:$8 sps:$4 sm:$0xff]   ;;  %v2471_v39 = vcombine.low %v67_v21, %v71_v22  ;;  %v2473_v40 = vcombine.low %v68_v23, %v72_v24 }
  0x67   :  { %v75_v33 = vld [vmem:[%s4026_s0 + $0x1c0] sm:$0xff]  ;;  %v76_v35 = vld [vmem:[%s4026_s0 + $0x1c8] sm:$0xff]  ;;  %v2831_v38 = vld [vmem:[%s4027_s1 + $0x2b4] ss:$8 sps:$4 sm:$0xff]   ;;  %vm1444_vm1 = vcmask 31744  }
  0x68   :  { %1878 = vmatpush2.bf16.msra.mxu0 %v2814_v25  ;;  %v79_v34 = vld [vmem:[%s4026_s0 + $0x1e0] sm:$0xff]  ;;  %v80_v36 = vld [vmem:[%s4026_s0 + $0x1e8] sm:$0xff]  ;;  %v2829_v43 = vld [vmem:[%s4027_s1 + $0x2b0] ss:$8 sps:$4 sm:$0xff]  }
  0x69   :  { %1879 = vmatprep.subr.bf16.mxu0 %v2822_v26  ;;  %v2826_v37 = vld [vmem:[%s4027_s1 + $0x2c0] ss:$8 sps:$4 sm:$0xff]   ;;  %v2480_v41 = vcombine.high %v75_v33, %v79_v34  ;;  %v2482_v42 = vcombine.high %v76_v35, %v80_v36  ;;  %v2837_v44 = vld [vmem:[%s4027_s1 + $0x2a4] ss:$8 sps:$4 sm:$0xff]   ;;  %v2840_v50 = vld [vmem:[%s4027_s1 + $0x294] ss:$8 sps:$4 sm:$0xff]   ;;  %v2479_v51 = vcombine.low %v75_v33, %v79_v34  ;;  %v2481_v52 = vcombine.low %v76_v35, %v80_v36 }
  0x6a   :  { %1580 = vmatmul.mubr.bf16.gmra.mxu0 %v2463_v27  ;;  %v83_v45 = vld [vmem:[%s4026_s0 + $0x200] sm:$0xff]  ;;  %v84_v47 = vld [vmem:[%s4026_s0 + $0x208] sm:$0xff]  ;;  %v2838_v55 = vld [vmem:[%s4027_s1 + $0x290] ss:$8 sps:$4 sm:$0xff]  }
  0x6b   :  { %1761 = vmatmul.mubr.bf16.gmra.mxu1 %v2465_v28  ;;  %1589 = vmatprep.mubr.bf16.mxu0 %v2472_v29  ;;  %v87_v46 = vld [vmem:[%s4026_s0 + $0x220] sm:$0xff]  ;;  %v88_v48 = vld [vmem:[%s4026_s0 + $0x228] sm:$0xff] }
  0x6c   :  { %1770 = vmatprep.mubr.bf16.mxu1 %v2474_v30  ;;  %1880 = vmatpush2.bf16.msra.mxu0 %v2820_v31  ;;  %v2835_v49 = vld [vmem:[%s4027_s1 + $0x2a0] ss:$8 sps:$4 sm:$0xff]   ;;  %v2488_v53 = vcombine.high %v83_v45, %v87_v46  ;;  %v2490_v54 = vcombine.high %v84_v47, %v88_v48  ;;  %v2849_v56 = vld [vmem:[%s4027_s1 + $0x284] ss:$8 sps:$4 sm:$0xff]   ;;  %v2487_v62 = vcombine.low %v83_v45, %v87_v46 }
  0x6d   :  { %1881 = vmatprep.subr.bf16.mxu0 %v2828_v32  ;;  %v91_v57 = vld [vmem:[%s4026_s0 + $0x240] sm:$0xff]  ;;  %v92_v59 = vld [vmem:[%s4026_s0 + $0x248] sm:$0xff]  ;;  %v2489_v63 = vcombine.low %v84_v47, %v88_v48  ;;  %v29_v48 = vld [vmem:[%s4026_s0 + $0x50] sm:$0xff] }
  0x6e   :  { %v95_v58 = vld [vmem:[%s4026_s0 + $0x260] sm:$0xff]  ;;  %v96_v60 = vld [vmem:[%s4026_s0 + $0x268] sm:$0xff] }
  0x6f   :  { %v2847_v61 = vld [vmem:[%s4027_s1 + $0x280] ss:$8 sps:$4 sm:$0xff]   ;;  %v2496_v0 = vcombine.high %v91_v57, %v95_v58  ;;  %v2498_v1 = vcombine.high %v92_v59, %v96_v60  ;;  %v2495_v6 = vcombine.low %v91_v57, %v95_v58  ;;  %v2497_v7 = vcombine.low %v92_v59, %v96_v60  ;;  %v41_v57 = vld [vmem:[%s4026_s0 + $0xb0] sm:$0xff]  ;;  %v38_v58 = vld [vmem:[%s4026_s0 + $0x98] sm:$0xff] }
  0x70   :  { %1882 = vmatpush2.bf16.msra.mxu0 %v2826_v37  ;;  %v99_v2 = vld [vmem:[%s4026_s0 + $0x280] sm:$0xff]  ;;  %v100_v4 = vld [vmem:[%s4026_s0 + $0x288] sm:$0xff]  ;;  %v42_v59 = vld [vmem:[%s4026_s0 + $0xb8] sm:$0xff] }
  0x71   :  { %1883 = vmatprep.subr.bf16.mxu0 %v2831_v38  ;;  %v103_v3 = vld [vmem:[%s4026_s0 + $0x2a0] sm:$0xff]  ;;  %v104_v5 = vld [vmem:[%s4026_s0 + $0x2a8] sm:$0xff] }
  0x72   :  { %1590 = vmatmul.mubr.bf16.gmra.mxu0 %v2471_v39  ;;  %v2504_v8 = vcombine.high %v99_v2, %v103_v3  ;;  %v2506_v9 = vcombine.high %v100_v4, %v104_v5  ;;  %v107_v10 = vld [vmem:[%s4026_s0 + $0x2c0] sm:$0xff]  ;;  %v108_v12 = vld [vmem:[%s4026_s0 + $0x2c8] sm:$0xff]  ;;  %v2503_v14 = vcombine.low %v99_v2, %v103_v3  ;;  %v2505_v15 = vcombine.low %v100_v4, %v104_v5  ;;  %v46_v2 = vld [vmem:[%s4026_s0 + $0xd8] sm:$0xff] }
  0x73   :  { %1771 = vmatmul.mubr.bf16.gmra.mxu1 %v2473_v40  ;;  %1599 = vmatprep.mubr.bf16.mxu0 %v2480_v41  ;;  %v111_v11 = vld [vmem:[%s4026_s0 + $0x2e0] sm:$0xff]  ;;  %v112_v13 = vld [vmem:[%s4026_s0 + $0x2e8] sm:$0xff]  ;;  %v21_v40 = vld [vmem:[%s4026_s0 + $0x10] sm:$0xff]  ;;  %v2445_v5 = vcombine.low %v38_v58, %v42_v59 }
  0x74   :  { %1780 = vmatprep.mubr.bf16.mxu1 %v2482_v42  ;;  %1884 = vmatpush2.bf16.msra.mxu0 %v2829_v43  ;;  %v2512_v16 = vcombine.high %v107_v10, %v111_v11  ;;  %v2514_v17 = vcombine.high %v108_v12, %v112_v13  ;;  %v115_v18 = vld [vmem:[%s4026_s0 + $0x300] sm:$0xff]  ;;  %v116_v20 = vld [vmem:[%s4026_s0 + $0x308] sm:$0xff]  ;;  %v2511_v22 = vcombine.low %v107_v10, %v111_v11  ;;  %v25_v41 = vld [vmem:[%s4026_s0 + $0x30] sm:$0xff] }
  0x75   :  { %1885 = vmatprep.subr.bf16.mxu0 %v2837_v44  ;;  %v119_v19 = vld [vmem:[%s4026_s0 + $0x320] sm:$0xff]  ;;  %v120_v21 = vld [vmem:[%s4026_s0 + $0x328] sm:$0xff]  ;;  %v2513_v23 = vcombine.low %v108_v12, %v112_v13  ;;  %v22_v42 = vld [vmem:[%s4026_s0 + $0x18] sm:$0xff]  ;;  %v2428_v46 = vcombine.high %v21_v40, %v25_v41 }
  0x76   :  { %v2520_v24 = vcombine.high %v115_v18, %v119_v19  ;;  %v2522_v25 = vcombine.high %v116_v20, %v120_v21  ;;  %v123_v26 = vld [vmem:[%s4026_s0 + $0x340] sm:$0xff]  ;;  %v124_v28 = vld [vmem:[%s4026_s0 + $0x348] sm:$0xff]  ;;  %v2519_v30 = vcombine.low %v115_v18, %v119_v19  ;;  %v2521_v31 = vcombine.low %v116_v20, %v120_v21  ;;  %v26_v43 = vld [vmem:[%s4026_s0 + $0x38] sm:$0xff] }
  0x77   :  { %v127_v27 = vld [vmem:[%s4026_s0 + $0x360] sm:$0xff]  ;;  %v128_v29 = vld [vmem:[%s4026_s0 + $0x368] sm:$0xff]  ;;  %v2430_v47 = vcombine.high %v22_v42, %v26_v43  ;;  %v50_v3 = vld [vmem:[%s4026_s0 + $0xf8] sm:$0xff] }
  0x78   :  { %1886 = vmatpush2.bf16.msra.mxu0 %v2835_v49  ;;  %v2528_v32 = vcombine.high %v123_v26, %v127_v27  ;;  %v2530_v33 = vcombine.high %v124_v28, %v128_v29  ;;  %v131_v34 = vld [vmem:[%s4026_s0 + $0x380] sm:$0xff]  ;;  %v132_v35 = vld [vmem:[%s4026_s0 + $0x388] sm:$0xff]  ;;  %v2527_v36 = vcombine.low %v123_v26, %v127_v27  ;;  %v2529_v37 = vcombine.low %v124_v28, %v128_v29  ;;  %v33_v49 = vld [vmem:[%s4026_s0 + $0x70] sm:$0xff] }
  0x79   :  { %1887 = vmatprep.subr.bf16.mxu0 %v2840_v50  ;;  %v2536_v38 = vcombine.high %v131_v34, %v131_v34  ;;  %v2538_v39 = vcombine.high %v132_v35, %v132_v35  ;;  %v2535_v44 = vcombine.low %v131_v34, %v131_v34  ;;  %v2537_v45 = vcombine.low %v132_v35, %v132_v35  ;;  %v30_v50 = vld [vmem:[%s4026_s0 + $0x58] sm:$0xff] }
  0x7a   :  { %1600 = vmatmul.mubr.bf16.gmra.mxu0 %v2479_v51  ;;  %v34_v51 = vld [vmem:[%s4026_s0 + $0x78] sm:$0xff]  ;;  %v2435_v60 = vcombine.low %v29_v48, %v33_v49  ;;  %v2453_v13 = vcombine.low %v46_v2, %v50_v3 }
  0x7b   :  { %1781 = vmatmul.mubr.bf16.gmra.mxu1 %v2481_v52  ;;  %1609 = vmatprep.mubr.bf16.mxu0 %v2488_v53  ;;  %v2427_v52 = vcombine.low %v21_v40, %v25_v41  ;;  %v2429_v53 = vcombine.low %v22_v42, %v26_v43  ;;  %v54_v10 = vld [vmem:[%s4026_s0 + $0x118] sm:$0xff]  ;;  %v85_v40 = vld [vmem:[%s4026_s0 + $0x210] sm:$0xff] }
  0x7c   :  { %1790 = vmatprep.mubr.bf16.mxu1 %v2490_v54  ;;  %1888 = vmatpush2.bf16.msra.mxu0 %v2838_v55  ;;  %v2436_v54 = vcombine.high %v29_v48, %v33_v49  ;;  %v2438_v55 = vcombine.high %v30_v50, %v34_v51  ;;  %v58_v11 = vld [vmem:[%s4026_s0 + $0x138] sm:$0xff]  ;;  %v89_v41 = vld [vmem:[%s4026_s0 + $0x230] sm:$0xff] }
  0x7d   :  { %1889 = vmatprep.subr.bf16.mxu0 %v2849_v56  ;;  %v37_v56 = vld [vmem:[%s4026_s0 + $0x90] sm:$0xff]  ;;  %v62_v18 = vld [vmem:[%s4026_s0 + $0x158] sm:$0xff]  ;;  %v2461_v21 = vcombine.low %v54_v10, %v58_v11 }
  0x7e   :  { %v2443_v4 = vcombine.low %v37_v56, %v41_v57  ;;  %v66_v19 = vld [vmem:[%s4026_s0 + $0x178] sm:$0xff]  ;;  %v93_v48 = vld [vmem:[%s4026_s0 + $0x250] sm:$0xff] }
  0x7f   :  { %v70_v26 = vld [vmem:[%s4026_s0 + $0x198] sm:$0xff]  ;;  %v2469_v29 = vcombine.low %v62_v18, %v66_v19  ;;  %v97_v49 = vld [vmem:[%s4026_s0 + $0x270] sm:$0xff] }
  0x80   :  { %1890 = vmatpush2.bf16.msra.mxu0 %v2847_v61  ;;  %v2437_v61 = vcombine.low %v30_v50, %v34_v51  ;;  %v74_v27 = vld [vmem:[%s4026_s0 + $0x1b8] sm:$0xff] }
  0x81   :  { %v78_v34 = vld [vmem:[%s4026_s0 + $0x1d8] sm:$0xff] }
  0x82   :  { %1610 = vmatmul.mubr.bf16.gmra.mxu0 %v2487_v62  ;;  %v2444_v62 = vcombine.high %v37_v56, %v41_v57  ;;  %v82_v35 = vld [vmem:[%s4026_s0 + $0x1f8] sm:$0xff]  ;;  %v101_v56 = vld [vmem:[%s4026_s0 + $0x290] sm:$0xff] }
  0x83   :  { %1791 = vmatmul.mubr.bf16.gmra.mxu1 %v2489_v63  ;;  %1619 = vmatprep.mubr.bf16.mxu0 %v2496_v0  ;;  %v2446_v63 = vcombine.high %v38_v58, %v42_v59  ;;  %v45_v0 = vld [vmem:[%s4026_s0 + $0xd0] sm:$0xff]  ;;  %v86_v42 = vld [vmem:[%s4026_s0 + $0x218] sm:$0xff] }
  0x84   :  { %1800 = vmatprep.mubr.bf16.mxu1 %v2498_v1  ;;  %v49_v1 = vld [vmem:[%s4026_s0 + $0xf0] sm:$0xff]  ;;  %v90_v43 = vld [vmem:[%s4026_s0 + $0x238] sm:$0xff] }
  0x85   :  { %v2451_v12 = vcombine.low %v45_v0, %v49_v1  ;;  %v94_v50 = vld [vmem:[%s4026_s0 + $0x258] sm:$0xff]  ;;  %v105_v57 = vld [vmem:[%s4026_s0 + $0x2b0] sm:$0xff] }
  0x86   :  { %v98_v51 = vld [vmem:[%s4026_s0 + $0x278] sm:$0xff] }
  0x87   :  { %v102_v58 = vld [vmem:[%s4026_s0 + $0x298] sm:$0xff] }
  0x88   :  { %v106_v59 = vld [vmem:[%s4026_s0 + $0x2b8] sm:$0xff] }
  0x8a   :  { %1620 = vmatmul.mubr.bf16.gmra.mxu0 %v2495_v6  ;;  %v2452_v6 = vcombine.high %v45_v0, %v49_v1  ;;  %v248_v0 = vld [vmem:[%s4029_s3] sm:$0xff] }
  0x8b   :  { %1801 = vmatmul.mubr.bf16.gmra.mxu1 %v2497_v7  ;;  %1629 = vmatprep.mubr.bf16.mxu0 %v2504_v8  ;;  %v2454_v7 = vcombine.high %v46_v2, %v50_v3  ;;  %v53_v8 = vld [vmem:[%s4026_s0 + $0x110] sm:$0xff]  ;;  %v249_v3 = vld [vmem:[%s4029_s3 + $0x8] sm:$0xff] }
  0x8c   :  { %1810 = vmatprep.mubr.bf16.mxu1 %v2506_v9  ;;  %v57_v9 = vld [vmem:[%s4026_s0 + $0x130] sm:$0xff] }
  0x8d   :  { %v2459_v20 = vcombine.low %v53_v8, %v57_v9 }
  0x92   :  { %1630 = vmatmul.mubr.bf16.gmra.mxu0 %v2503_v14  ;;  %v2460_v14 = vcombine.high %v53_v8, %v57_v9  ;;  %v113_v9 = vld [vmem:[%s4026_s0 + $0x2f0] sm:$0xff] }
  0x93   :  { %1811 = vmatmul.mubr.bf16.gmra.mxu1 %v2505_v15  ;;  %1639 = vmatprep.mubr.bf16.mxu0 %v2512_v16  ;;  %v2462_v15 = vcombine.high %v54_v10, %v58_v11  ;;  %v61_v16 = vld [vmem:[%s4026_s0 + $0x150] sm:$0xff]  ;;  %v110_v10 = vld [vmem:[%s4026_s0 + $0x2d8] sm:$0xff] }
  0x94   :  { %1820 = vmatprep.mubr.bf16.mxu1 %v2514_v17  ;;  %v65_v17 = vld [vmem:[%s4026_s0 + $0x170] sm:$0xff]  ;;  %v114_v11 = vld [vmem:[%s4026_s0 + $0x2f8] sm:$0xff] }
  0x95   :  { %v2467_v28 = vcombine.low %v61_v16, %v65_v17 }
  0x9a   :  { %1640 = vmatmul.mubr.bf16.gmra.mxu0 %v2511_v22  ;;  %v2468_v22 = vcombine.high %v61_v16, %v65_v17  ;;  %v251_v16 = vld [vmem:[%s4029_s3 + $0x18] sm:$0xff]  ;;  %v2507_v17 = vcombine.low %v101_v56, %v105_v57 }
  0x9b   :  { %1821 = vmatmul.mubr.bf16.gmra.mxu1 %v2513_v23  ;;  %1649 = vmatprep.mubr.bf16.mxu0 %v2520_v24  ;;  %v2470_v23 = vcombine.high %v62_v18, %v66_v19  ;;  %v69_v24 = vld [vmem:[%s4026_s0 + $0x190] sm:$0xff]  ;;  %v2509_v18 = vcombine.low %v102_v58, %v106_v59 }
  0x9c   :  { %1830 = vmatprep.mubr.bf16.mxu1 %v2522_v25  ;;  %v73_v25 = vld [vmem:[%s4026_s0 + $0x1b0] sm:$0xff] }
  0xa2   :  { %1650 = vmatmul.mubr.bf16.gmra.mxu0 %v2519_v30  ;;  %v2476_v30 = vcombine.high %v69_v24, %v73_v25 }
  0xa3   :  { %1831 = vmatmul.mubr.bf16.gmra.mxu1 %v2521_v31  ;;  %1659 = vmatprep.mubr.bf16.mxu0 %v2528_v32  ;;  %v2478_v31 = vcombine.high %v70_v26, %v74_v27  ;;  %v77_v32 = vld [vmem:[%s4026_s0 + $0x1d0] sm:$0xff] }
  0xa4   :  { %1840 = vmatprep.mubr.bf16.mxu1 %v2530_v33  ;;  %v81_v33 = vld [vmem:[%s4026_s0 + $0x1f0] sm:$0xff] }
  0xaa   :  { %1660 = vmatmul.mubr.bf16.gmra.mxu0 %v2527_v36  ;;  %v2475_v36 = vcombine.low %v69_v24, %v73_v25  ;;  %v252_v25 = vld [vmem:[%s4029_s3 + $0x20] sm:$0xff] }
  0xab   :  { %1841 = vmatmul.mubr.bf16.gmra.mxu1 %v2529_v37  ;;  %1669 = vmatprep.mubr.bf16.mxu0 %v2536_v38  ;;  %v2477_v37 = vcombine.low %v70_v26, %v74_v27  ;;  %v2484_v38 = vcombine.high %v77_v32, %v81_v33 }
  0xac   :  { %1850 = vmatprep.mubr.bf16.mxu1 %v2538_v39  ;;  %v2486_v39 = vcombine.high %v78_v34, %v82_v35 }
  0xb2   :  { %1670 = vmatmul.mubr.bf16.gmra.mxu0 %v2535_v44  ;;  %v2483_v44 = vcombine.low %v77_v32, %v81_v33  ;;  %v254_v33 = vld [vmem:[%s4029_s3 + $0x30] sm:$0xff] }
  0xb3   :  { %1851 = vmatmul.mubr.bf16.gmra.mxu1 %v2537_v45  ;;  %1891 = vmatprep.mubr.bf16.mxu0 %v2428_v46  ;;  %v2485_v45 = vcombine.low %v78_v34, %v82_v35  ;;  %v2492_v46 = vcombine.high %v85_v40, %v89_v41  ;;  %v117_v34 = vld [vmem:[%s4026_s0 + $0x310] sm:$0xff] }
  0xb4   :  { %2658 = vmatprep.mubr.msk.bf16.mxu1 %vm1444_vm1, %v2430_v47  ;;  %v2494_v47 = vcombine.high %v86_v42, %v90_v43 }
  0xba   :  { %1892 = vmatmul.mubr.bf16.vlgmr.msra.gmra.mxu0 %v2427_v52  ;;  %v2491_v52 = vcombine.low %v85_v40, %v89_v41 }
  0xbb   :  { %2073 = vmatmul.mubr.bf16.vlgmr.msra.gmra.mxu1 %v2429_v53  ;;  %1901 = vmatprep.mubr.bf16.mxu0 %v2436_v54  ;;  %v2493_v53 = vcombine.low %v86_v42, %v90_v43  ;;  %v2500_v54 = vcombine.high %v93_v48, %v97_v49 }
  0xbc   :  { %2659 = vmatprep.mubr.msk.bf16.mxu1 %vm1444_vm1, %v2438_v55  ;;  %v2502_v55 = vcombine.high %v94_v50, %v98_v51 }
  0xc2   :  { %1902 = vmatmul.mubr.bf16.gmra.mxu0 %v2435_v60  ;;  %v2499_v60 = vcombine.low %v93_v48, %v97_v49 }
  0xc3   :  { %2083 = vmatmul.mubr.bf16.gmra.mxu1 %v2437_v61  ;;  %1911 = vmatprep.mubr.bf16.mxu0 %v2444_v62  ;;  %v2501_v61 = vcombine.low %v94_v50, %v98_v51  ;;  %v2508_v62 = vcombine.high %v101_v56, %v105_v57 }
  0xc4   :  { %2660 = vmatprep.mubr.msk.bf16.mxu1 %vm1444_vm1, %v2446_v63  ;;  %v2510_v63 = vcombine.high %v102_v58, %v106_v59  ;;  %v257_v58 = vld [vmem:[%s4029_s3 + $0x48] sm:$0xff] }
  0xca   :  { %1912 = vmatmul.mubr.bf16.gmra.mxu0 %v2443_v4 }
  0xcb   :  { %2093 = vmatmul.mubr.bf16.gmra.mxu1 %v2445_v5  ;;  %1921 = vmatprep.mubr.bf16.mxu0 %v2452_v6  ;;  %v250_v5 = vld [vmem:[%s4029_s3 + $0x10] sm:$0xff] }
  0xcc   :  { %2661 = vmatprep.mubr.msk.bf16.mxu1 %vm1444_vm1, %v2454_v7  ;;  %v109_v6 = vld [vmem:[%s4026_s0 + $0x2d0] sm:$0xff] }
  0xd2   :  { %1922 = vmatmul.mubr.bf16.gmra.mxu0 %v2451_v12 }
  0xd3   :  { %2103 = vmatmul.mubr.bf16.gmra.mxu1 %v2453_v13  ;;  %1931 = vmatprep.mubr.bf16.mxu0 %v2460_v14 }
  0xd4   :  { %2662 = vmatprep.mubr.msk.bf16.mxu1 %vm1444_vm1, %v2462_v15 }
  0xda   :  { %1932 = vmatmul.mubr.bf16.gmra.mxu0 %v2459_v20 }
  0xdb   :  { %2113 = vmatmul.mubr.bf16.gmra.mxu1 %v2461_v21  ;;  %1941 = vmatprep.mubr.bf16.mxu0 %v2468_v22  ;;  %v2516_v21 = vcombine.high %v109_v6, %v113_v9  ;;  %v2518_v22 = vcombine.high %v110_v10, %v114_v11 }
  0xdc   :  { %2663 = vmatprep.mubr.msk.bf16.mxu1 %vm1444_vm1, %v2470_v23 }
  0xe2   :  { %1942 = vmatmul.mubr.bf16.gmra.mxu0 %v2467_v28 }
  0xe3   :  { %2123 = vmatmul.mubr.bf16.gmra.mxu1 %v2469_v29  ;;  %1951 = vmatprep.mubr.bf16.mxu0 %v2476_v30  ;;  %v253_v30 = vld [vmem:[%s4029_s3 + $0x28] sm:$0xff] }
  0xe4   :  { %2664 = vmatprep.mubr.msk.bf16.mxu1 %vm1444_vm1, %v2478_v31 }
  0xea   :  { %1952 = vmatmul.mubr.bf16.gmra.mxu0 %v2475_v36 }
  0xeb   :  { %2133 = vmatmul.mubr.bf16.gmra.mxu1 %v2477_v37  ;;  %1961 = vmatprep.mubr.bf16.mxu0 %v2484_v38  ;;  %v121_v37 = vld [vmem:[%s4026_s0 + $0x330] sm:$0xff]  ;;  %v118_v38 = vld [vmem:[%s4026_s0 + $0x318] sm:$0xff] }
  0xec   :  { %2665 = vmatprep.mubr.msk.bf16.mxu1 %vm1444_vm1, %v2486_v39  ;;  %v122_v39 = vld [vmem:[%s4026_s0 + $0x338] sm:$0xff]  ;;  %v2524_v49 = vcombine.high %v117_v34, %v121_v37 }
  0xed   :  { %v2526_v50 = vcombine.high %v118_v38, %v122_v39 }
  0xf2   :  { %1962 = vmatmul.mubr.bf16.gmra.mxu0 %v2483_v44  ;;  %v255_v44 = vld [vmem:[%s4029_s3 + $0x38] sm:$0xff] }
  0xf3   :  { %2143 = vmatmul.mubr.bf16.gmra.mxu1 %v2485_v45  ;;  %1971 = vmatprep.mubr.bf16.mxu0 %v2492_v46  ;;  %v2515_v45 = vcombine.low %v109_v6, %v113_v9  ;;  %v2517_v46 = vcombine.low %v110_v10, %v114_v11  ;;  %v2523_v9 = vcombine.low %v117_v34, %v121_v37 }
  0xf4   :  { %2666 = vmatprep.mubr.msk.bf16.mxu1 %vm1444_vm1, %v2494_v47  ;;  %v2525_v10 = vcombine.low %v118_v38, %v122_v39  ;;  %v263_v38 = vld [vmem:[%s4029_s3 + $0x78] sm:$0xff] }
  0xfa   :  { %1972 = vmatmul.mubr.bf16.gmra.mxu0 %v2491_v52 }
  0xfb   :  { %2153 = vmatmul.mubr.bf16.gmra.mxu1 %v2493_v53  ;;  %1981 = vmatprep.mubr.bf16.mxu0 %v2500_v54  ;;  %v256_v53 = vld [vmem:[%s4029_s3 + $0x40] sm:$0xff] }
  0xfc   :  { %2667 = vmatprep.mubr.msk.bf16.mxu1 %vm1444_vm1, %v2502_v55 }
 0x102   :  { %v1531_v1 = vpop.f32.mrf.mxu0  ;;  %1982 = vmatmul.mubr.bf16.gmra.mxu0 %v2499_v60 }
 0x103   :  { %v1712_v2 = vpop.f32.mrf.mxu1  ;;  %2163 = vmatmul.mubr.bf16.gmra.mxu1 %v2501_v61  ;;  %v1532_v4 = vadd.f32 %v1531_v1, %v248_v0  ;;  %1991 = vmatprep.mubr.bf16.mxu0 %v2508_v62  ;;  %v258_v61 = vld [vmem:[%s4029_s3 + $0x50] sm:$0xff] }
 0x104   :  { %2668 = vmatprep.mubr.msk.bf16.mxu1 %vm1444_vm1, %v2510_v63  ;;  %v1533_v7 = vpop.f32.mrf.mxu0  ;;  %v125_v62 = vld [vmem:[%s4026_s0 + $0x350] sm:$0xff] }
 0x105   :  { %v1714_v8 = vpop.f32.mrf.mxu1  ;;  %v3585_v12 = vadd.f32 %v1712_v2, %v1532_v4  ;;  %v1534_v13 = vadd.f32 %v1533_v7, %v249_v3  ;;  %v129_v1 = vld [vmem:[%s4026_s0 + $0x370] sm:$0xff]  ;;  %v126_v2 = vld [vmem:[%s4026_s0 + $0x358] sm:$0xff] }
 0x106   :  { %v1535_v14 = vpop.f32.mrf.mxu0  ;;  %v130_v3 = vld [vmem:[%s4026_s0 + $0x378] sm:$0xff]  ;;  %v2531_v39 = vcombine.low %v125_v62, %v129_v1 }
 0x107   :  { %v1716_v15 = vpop.f32.mrf.mxu1  ;;  %v3590_v19 = vadd.f32 %v1714_v8, %v1534_v13  ;;  %v1536_v20 = vadd.f32 %v1535_v14, %v250_v5  ;;  %v259_v8 = vld [vmem:[%s4029_s3 + $0x58] sm:$0xff]  ;;  %v2532_v14 = vcombine.high %v125_v62, %v129_v1 }
 0x108   :  { %v1537_v23 = vpop.f32.mrf.mxu0 }
 0x109   :  { %v1718_v24 = vpop.f32.mrf.mxu1  ;;  %v3595_v26 = vadd.f32 %v1716_v15, %v1536_v20  ;;  %v1538_v27 = vadd.f32 %v1537_v23, %v251_v16  ;;  %v2534_v15 = vcombine.high %v126_v2, %v130_v3 }
 0x10a   :  { %v1541_v28 = vpop.f32.mrf.mxu0  ;;  %1992 = vmatmul.mubr.bf16.gmra.mxu0 %v2507_v17 }
 0x10b   :  { %v1722_v29 = vpop.f32.mrf.mxu1  ;;  %2173 = vmatmul.mubr.bf16.gmra.mxu1 %v2509_v18  ;;  %v3600_v31 = vadd.f32 %v1718_v24, %v1538_v27  ;;  %v1542_v32 = vadd.f32 %v1541_v28, %v252_v25  ;;  %2001 = vmatprep.mubr.bf16.mxu0 %v2516_v21  ;;  %v260_v18 = vld [vmem:[%s4029_s3 + $0x60] sm:$0xff]  ;;  %v261_v24 = vld [vmem:[%s4029_s3 + $0x68] sm:$0xff] }
 0x10c   :  { %2669 = vmatprep.mubr.msk.bf16.mxu1 %vm1444_vm1, %v2518_v22  ;;  %v1543_v35 = vpop.f32.mrf.mxu0 }
 0x10d   :  { %v1724_v36 = vpop.f32.mrf.mxu1  ;;  %v3618_v40 = vadd.f32 %v1722_v29, %v1542_v32  ;;  %v1544_v41 = vadd.f32 %v1543_v35, %v253_v30  ;;  %v262_v30 = vld [vmem:[%s4029_s3 + $0x70] sm:$0xff] }
 0x10e   :  { %v1545_v42 = vpop.f32.mrf.mxu0  ;;  %v133_v32 = vld [vmem:[%s4026_s0 + $0x390] sm:$0xff] }
 0x10f   :  { %v1726_v43 = vpop.f32.mrf.mxu1  ;;  %v3623_v47 = vadd.f32 %v1724_v36, %v1544_v41  ;;  %v1546_v48 = vadd.f32 %v1545_v42, %v254_v33  ;;  %v134_v33 = vld [vmem:[%s4026_s0 + $0x398] sm:$0xff]  ;;  %v2533_v41 = vcombine.low %v126_v2, %v130_v3  ;;  %v2539_v3 = vcombine.low %v133_v32, %v133_v32 }
 0x110   :  { %v1547_v51 = vpop.f32.mrf.mxu0  ;;  %v267_v2 = vld [vmem:[%s4029_s3 + $0x98] sm:$0xff] }
 0x111   :  { %v1728_v52 = vpop.f32.mrf.mxu1  ;;  %v3628_v54 = vadd.f32 %v1726_v43, %v1546_v48  ;;  %v1548_v55 = vadd.f32 %v1547_v51, %v255_v44  ;;  %v2540_v44 = vcombine.high %v133_v32, %v133_v32  ;;  %v271_v32 = vld [vmem:[%s4029_s3 + $0xb8] sm:$0xff] }
 0x112   :  { %v1551_v56 = vpop.f32.mrf.mxu0  ;;  %2002 = vmatmul.mubr.bf16.gmra.mxu0 %v2515_v45  ;;  %v2542_v45 = vcombine.high %v134_v33, %v134_v33 }
 0x113   :  { %v1732_v57 = vpop.f32.mrf.mxu1  ;;  %2183 = vmatmul.mubr.bf16.gmra.mxu1 %v2517_v46  ;;  %v3633_v59 = vadd.f32 %v1728_v52, %v1548_v55  ;;  %v1552_v60 = vadd.f32 %v1551_v56, %v256_v53  ;;  %2011 = vmatprep.mubr.bf16.mxu0 %v2524_v49  ;;  %v264_v49 = vld [vmem:[%s4029_s3 + $0x80] sm:$0xff]  ;;  %v265_v55 = vld [vmem:[%s4029_s3 + $0x88] sm:$0xff] }
 0x114   :  { %2670 = vmatprep.mubr.msk.bf16.mxu1 %vm1444_vm1, %v2526_v50  ;;  %v1553_v63 = vpop.f32.mrf.mxu0 }
 0x115   :  { %v1734_v0 = vpop.f32.mrf.mxu1  ;;  %v3651_v4 = vadd.f32 %v1732_v57, %v1552_v60  ;;  %v1554_v5 = vadd.f32 %v1553_v63, %v257_v58 }
 0x116   :  { %v1555_v6 = vpop.f32.mrf.mxu0 }
 0x117   :  { %v1736_v7 = vpop.f32.mrf.mxu1  ;;  %v3656_v11 = vadd.f32 %v1734_v0, %v1554_v5  ;;  %v1556_v13 = vadd.f32 %v1555_v6, %v258_v61  ;;  %v266_v61 = vld [vmem:[%s4029_s3 + $0x90] sm:$0xff]  ;;  %v2541_v5 = vcombine.low %v134_v33, %v134_v33 }
 0x118   :  { %v1557_v16 = vpop.f32.mrf.mxu0 }
 0x119   :  { %v1738_v17 = vpop.f32.mrf.mxu1  ;;  %v3661_v20 = vadd.f32 %v1736_v7, %v1556_v13  ;;  %v1558_v21 = vadd.f32 %v1557_v16, %v259_v8 }
 0x11a   :  { %v1561_v22 = vpop.f32.mrf.mxu0  ;;  %2012 = vmatmul.mubr.bf16.gmra.mxu0 %v2523_v9 }
 0x11b   :  { %v1742_v23 = vpop.f32.mrf.mxu1  ;;  %2193 = vmatmul.mubr.bf16.gmra.mxu1 %v2525_v10  ;;  %v3666_v25 = vadd.f32 %v1738_v17, %v1558_v21  ;;  %v1562_v27 = vadd.f32 %v1561_v22, %v260_v18  ;;  %2021 = vmatprep.mubr.bf16.mxu0 %v2532_v14  ;;  %v268_v10 = vld [vmem:[%s4029_s3 + $0xa0] sm:$0xff]  ;;  %v269_v17 = vld [vmem:[%s4029_s3 + $0xa8] sm:$0xff] }
 0x11c   :  { %2671 = vmatprep.mubr.msk.bf16.mxu1 %vm1444_vm1, %v2534_v15  ;;  %v1563_v28 = vpop.f32.mrf.mxu0 }
 0x11d   :  { %v1744_v29 = vpop.f32.mrf.mxu1  ;;  %v3678_v34 = vadd.f32 %v1742_v23, %v1562_v27  ;;  %v1564_v35 = vadd.f32 %v1563_v28, %v261_v24  ;;  %v270_v24 = vld [vmem:[%s4029_s3 + $0xb0] sm:$0xff] }
 0x11e   :  { %v1565_v36 = vpop.f32.mrf.mxu0 }
 0x11f   :  { %v1746_v37 = vpop.f32.mrf.mxu1  ;;  %v3683_v42 = vadd.f32 %v1744_v29, %v1564_v35  ;;  %v1566_v43 = vadd.f32 %v1565_v36, %v262_v30 }
 0x120   :  { %v1567_v46 = vpop.f32.mrf.mxu0 }
 0x121   :  { %v1748_v48 = vpop.f32.mrf.mxu1  ;;  %v3688_v50 = vadd.f32 %v1746_v37, %v1566_v43  ;;  %v1568_v51 = vadd.f32 %v1567_v46, %v263_v38  ;;  %v272_v38 = vld [vmem:[%s4029_s3 + $0xc0] sm:$0xff] }
 0x122   :  { %v1571_v52 = vpop.f32.mrf.mxu0  ;;  %2022 = vmatmul.mubr.bf16.gmra.mxu0 %v2531_v39 }
 0x123   :  { %v1752_v53 = vpop.f32.mrf.mxu1  ;;  %2203 = vmatmul.mubr.bf16.gmra.mxu1 %v2533_v41  ;;  %v3693_v56 = vadd.f32 %v1748_v48, %v1568_v51  ;;  %v1572_v57 = vadd.f32 %v1571_v52, %v264_v49  ;;  %2031 = vmatprep.mubr.bf16.mxu0 %v2540_v44  ;;  %v274_v52 = vld [vmem:[%s4029_s3 + $0xd0] sm:$0xff] }
 0x124   :  { %2672 = vmatprep.mubr.msk.bf16.mxu1 %vm1444_vm1, %v2542_v45  ;;  %v1573_v58 = vpop.f32.mrf.mxu0  ;;  %v273_v45 = vld [vmem:[%s4029_s3 + $0xc8] sm:$0xff] }
 0x125   :  { %v1754_v60 = vpop.f32.mrf.mxu1  ;;  %v3699_v62 = vadd.f32 %v1752_v53, %v1572_v57  ;;  %v1574_v63 = vadd.f32 %v1573_v58, %v265_v55 }
 0x126   :  { %v1575_v0 = vpop.f32.mrf.mxu0 }
 0x127   :  { %v1756_v1 = vpop.f32.mrf.mxu1  ;;  %v3704_v6 = vadd.f32 %v1754_v60, %v1574_v63  ;;  %v1576_v7 = vadd.f32 %v1575_v0, %v266_v61  ;;  %v275_v60 = vld [vmem:[%s4029_s3 + $0xd8] sm:$0xff] }
 0x128   :  { %v1577_v8 = vpop.f32.mrf.mxu0 }
 0x129   :  { %v1758_v9 = vpop.f32.mrf.mxu1  ;;  %v3709_v13 = vadd.f32 %v1756_v1, %v1576_v7  ;;  %v1578_v14 = vadd.f32 %v1577_v8, %v267_v2  ;;  %v276_v2 = vld [vmem:[%s4029_s3 + $0xe0] sm:$0xff] }
 0x12a   :  { %v1581_v15 = vpop.f32.mrf.mxu0  ;;  %2032 = vmatmul.mubr.bf16.gmra.mxu0 %v2539_v3 }
 0x12b   :  { %v1762_v16 = vpop.f32.mrf.mxu1  ;;  %2213 = vmatmul.mubr.bf16.gmra.mxu1 %v2541_v5  ;;  %v3714_v18 = vadd.f32 %v1758_v9, %v1578_v14  ;;  %v1582_v21 = vadd.f32 %v1581_v15, %v268_v10  ;;  %v277_v9 = vld [vmem:[%s4029_s3 + $0xe8] sm:$0xff] }
 0x12c   :  { %v1583_v22 = vpop.f32.mrf.mxu0 }
 0x12d   :  { %v1764_v23 = vpop.f32.mrf.mxu1  ;;  %v3719_v27 = vadd.f32 %v1762_v16, %v1582_v21  ;;  %v1584_v28 = vadd.f32 %v1583_v22, %v269_v17  ;;  %v278_v17 = vld [vmem:[%s4029_s3 + $0xf0] sm:$0xff] }
 0x12e   :  { %v1585_v29 = vpop.f32.mrf.mxu0 }
 0x12f   :  { %v1766_v30 = vpop.f32.mrf.mxu1  ;;  %v3724_v33 = vadd.f32 %v1764_v23, %v1584_v28  ;;  %v1586_v35 = vadd.f32 %v1585_v29, %v270_v24  ;;  %v279_v28 = vld [vmem:[%s4029_s3 + $0xf8] sm:$0xff] }
 0x130   :  { %v1587_v36 = vpop.f32.mrf.mxu0 }
 0x131   :  { %v1768_v37 = vpop.f32.mrf.mxu1  ;;  %v3729_v39 = vadd.f32 %v1766_v30, %v1586_v35  ;;  %v1588_v41 = vadd.f32 %v1587_v36, %v271_v32  ;;  %v280_v36 = vld [vmem:[%s4029_s3 + $0x100] sm:$0xff] }
 0x132   :  { %v1591_v43 = vpop.f32.mrf.mxu0 }
 0x133   :  { %v1772_v44 = vpop.f32.mrf.mxu1  ;;  %v3734_v46 = vadd.f32 %v1768_v37, %v1588_v41  ;;  %v1592_v48 = vadd.f32 %v1591_v43, %v272_v38 }
 0x134   :  { %v1593_v49 = vpop.f32.mrf.mxu0 }
 0x135   :  { %v1774_v51 = vpop.f32.mrf.mxu1  ;;  %v3739_v53 = vadd.f32 %v1772_v44, %v1592_v48  ;;  %v1594_v55 = vadd.f32 %v1593_v49, %v273_v45  ;;  %v281_v44 = vld [vmem:[%s4029_s3 + $0x108] sm:$0xff] }
 0x136   :  { %v1595_v57 = vpop.f32.mrf.mxu0 }
 0x137   :  { %v1776_v58 = vpop.f32.mrf.mxu1  ;;  %v3744_v61 = vadd.f32 %v1774_v51, %v1594_v55  ;;  %v1596_v63 = vadd.f32 %v1595_v57, %v274_v52  ;;  %v282_v52 = vld [vmem:[%s4029_s3 + $0x110] sm:$0xff] }
 0x138   :  { %v1597_v0 = vpop.f32.mrf.mxu0 }
 0x139   :  { %v1778_v1 = vpop.f32.mrf.mxu1  ;;  %v3749_v3 = vadd.f32 %v1776_v58, %v1596_v63  ;;  %v1598_v5 = vadd.f32 %v1597_v0, %v275_v60  ;;  %v283_v63 = vld [vmem:[%s4029_s3 + $0x118] sm:$0xff] }
 0x13a   :  { %v1601_v7 = vpop.f32.mrf.mxu0 }
 0x13b   :  { %v1782_v8 = vpop.f32.mrf.mxu1  ;;  %v3754_v10 = vadd.f32 %v1778_v1, %v1598_v5  ;;  %v1602_v14 = vadd.f32 %v1601_v7, %v276_v2  ;;  %v284_v7 = vld [vmem:[%s4029_s3 + $0x120] sm:$0xff] }
 0x13c   :  { %v1603_v15 = vpop.f32.mrf.mxu0 }
 0x13d   :  { %v1784_v16 = vpop.f32.mrf.mxu1  ;;  %v3759_v21 = vadd.f32 %v1782_v8, %v1602_v14  ;;  %v1604_v22 = vadd.f32 %v1603_v15, %v277_v9 }
 0x13e   :  { %v1605_v23 = vpop.f32.mrf.mxu0 }
 0x13f   :  { %v1786_v24 = vpop.f32.mrf.mxu1  ;;  %v3764_v29 = vadd.f32 %v1784_v16, %v1604_v22  ;;  %v1606_v30 = vadd.f32 %v1605_v23, %v278_v17  ;;  %v285_v16 = vld [vmem:[%s4029_s3 + $0x128] sm:$0xff] }
 0x140   :  { %v1607_v32 = vpop.f32.mrf.mxu0 }
 0x141   :  { %v1788_v35 = vpop.f32.mrf.mxu1  ;;  %v3769_v37 = vadd.f32 %v1786_v24, %v1606_v30  ;;  %v1608_v38 = vadd.f32 %v1607_v32, %v279_v28  ;;  %v286_v28 = vld [vmem:[%s4029_s3 + $0x130] sm:$0xff] }
 0x142   :  { %v1611_v41 = vpop.f32.mrf.mxu0 }
 0x143   :  { %v1792_v43 = vpop.f32.mrf.mxu1  ;;  %v3774_v45 = vadd.f32 %v1788_v35, %v1608_v38  ;;  %v1612_v48 = vadd.f32 %v1611_v41, %v280_v36  ;;  %v287_v38 = vld [vmem:[%s4029_s3 + $0x138] sm:$0xff] }
 0x144   :  { %v1613_v49 = vpop.f32.mrf.mxu0 }
 0x145   :  { %v1794_v51 = vpop.f32.mrf.mxu1  ;;  %v3779_v55 = vadd.f32 %v1792_v43, %v1612_v48  ;;  %v1614_v57 = vadd.f32 %v1613_v49, %v281_v44  ;;  %v288_v49 = vld [vmem:[%s4029_s3 + $0x140] sm:$0xff] }
 0x146   :  { %v1615_v58 = vpop.f32.mrf.mxu0 }
 0x147   :  { %v1796_v60 = vpop.f32.mrf.mxu1  ;;  %v3784_v0 = vadd.f32 %v1794_v51, %v1614_v57  ;;  %v1616_v1 = vadd.f32 %v1615_v58, %v282_v52 }
 0x148   :  { %v1617_v2 = vpop.f32.mrf.mxu0 }
 0x149   :  { %v1798_v5 = vpop.f32.mrf.mxu1  ;;  %v3789_v8 = vadd.f32 %v1796_v60, %v1616_v1  ;;  %v1618_v9 = vadd.f32 %v1617_v2, %v283_v63  ;;  %v289_v60 = vld [vmem:[%s4029_s3 + $0x148] sm:$0xff] }
 0x14a   :  { %v1621_v14 = vpop.f32.mrf.mxu0 }
 0x14b   :  { %v1802_v15 = vpop.f32.mrf.mxu1  ;;  %v3794_v17 = vadd.f32 %v1798_v5, %v1618_v9  ;;  %v1622_v22 = vadd.f32 %v1621_v14, %v284_v7  ;;  %v290_v7 = vld [vmem:[%s4029_s3 + $0x150] sm:$0xff] }
 0x14c   :  { %v1623_v23 = vpop.f32.mrf.mxu0 }
 0x14d   :  { %v1804_v24 = vpop.f32.mrf.mxu1  ;;  %v3799_v30 = vadd.f32 %v1802_v15, %v1622_v22  ;;  %v1624_v32 = vadd.f32 %v1623_v23, %v285_v16  ;;  %v291_v22 = vld [vmem:[%s4029_s3 + $0x158] sm:$0xff] }
 0x14e   :  { %v1625_v35 = vpop.f32.mrf.mxu0 }
 0x14f   :  { %v1806_v36 = vpop.f32.mrf.mxu1  ;;  %v3804_v41 = vadd.f32 %v1804_v24, %v1624_v32  ;;  %v1626_v43 = vadd.f32 %v1625_v35, %v286_v28  ;;  %v292_v35 = vld [vmem:[%s4029_s3 + $0x160] sm:$0xff] }
 0x150   :  { %v1627_v44 = vpop.f32.mrf.mxu0 }
 0x151   :  { %v1808_v48 = vpop.f32.mrf.mxu1  ;;  %v3809_v51 = vadd.f32 %v1806_v36, %v1626_v43  ;;  %v1628_v52 = vadd.f32 %v1627_v44, %v287_v38 }
 0x152   :  { %v1631_v57 = vpop.f32.mrf.mxu0 }
 0x153   :  { %v1812_v58 = vpop.f32.mrf.mxu1  ;;  %v3814_v63 = vadd.f32 %v1808_v48, %v1628_v52  ;;  %v1632_v1 = vadd.f32 %v1631_v57, %v288_v49  ;;  %v293_v48 = vld [vmem:[%s4029_s3 + $0x168] sm:$0xff] }
 0x154   :  { %v1633_v2 = vpop.f32.mrf.mxu0 }
 0x155   :  { %v1814_v5 = vpop.f32.mrf.mxu1  ;;  %v3819_v9 = vadd.f32 %v1812_v58, %v1632_v1  ;;  %v1634_v14 = vadd.f32 %v1633_v2, %v289_v60  ;;  %v294_v60 = vld [vmem:[%s4029_s3 + $0x170] sm:$0xff] }
 0x156   :  { %v1635_v15 = vpop.f32.mrf.mxu0 }
 0x157   :  { %v1816_v16 = vpop.f32.mrf.mxu1  ;;  %v3824_v23 = vadd.f32 %v1814_v5, %v1634_v14  ;;  %v1636_v24 = vadd.f32 %v1635_v15, %v290_v7  ;;  %v295_v14 = vld [vmem:[%s4029_s3 + $0x178] sm:$0xff] }
 0x158   :  { %v1637_v28 = vpop.f32.mrf.mxu0 }
 0x159   :  { %v1818_v32 = vpop.f32.mrf.mxu1  ;;  %v3829_v36 = vadd.f32 %v1816_v16, %v1636_v24  ;;  %v1638_v38 = vadd.f32 %v1637_v28, %v291_v22  ;;  %v296_v28 = vld [vmem:[%s4029_s3 + $0x180] sm:$0xff] }
 0x15a   :  { %v1641_v43 = vpop.f32.mrf.mxu0 }
 0x15b   :  { %v1822_v44 = vpop.f32.mrf.mxu1  ;;  %v3834_v49 = vadd.f32 %v1818_v32, %v1638_v38  ;;  %v1642_v52 = vadd.f32 %v1641_v43, %v292_v35 }
 0x15c   :  { %v1643_v57 = vpop.f32.mrf.mxu0 }
 0x15d   :  { %4031 = vst [vmem:[#allocation5_spill] sm:$0xff] %v3834_v49  ;;  %v1824_v58 = vpop.f32.mrf.mxu1  ;;  %v3839_v1 = vadd.f32 %v1822_v44, %v1642_v52  ;;  %v1644_v2 = vadd.f32 %v1643_v57, %v293_v48  ;;  %v297_v44 = vld [vmem:[%s4029_s3 + $0x188] sm:$0xff] }
 0x15e   :  { %v1645_v5 = vpop.f32.mrf.mxu0 }
 0x15f   :  { %4032 = vst [vmem:[#allocation6_spill] sm:$0xff] %v3839_v1  ;;  %v1826_v7 = vpop.f32.mrf.mxu1  ;;  %v3844_v15 = vadd.f32 %v1824_v58, %v1644_v2  ;;  %v1646_v16 = vadd.f32 %v1645_v5, %v294_v60  ;;  %v298_v60 = vld [vmem:[%s4029_s3 + $0x190] sm:$0xff] }
 0x160   :  { %v1647_v22 = vpop.f32.mrf.mxu0 }
 0x161   :  { %4033 = vst [vmem:[#allocation7_spill] sm:$0xff] %v3844_v15  ;;  %v1828_v24 = vpop.f32.mrf.mxu1  ;;  %v3849_v32 = vadd.f32 %v1826_v7, %v1646_v16  ;;  %v1648_v35 = vadd.f32 %v1647_v22, %v295_v14  ;;  %v299_v16 = vld [vmem:[%s4029_s3 + $0x198] sm:$0xff] }
 0x162   :  { %v1651_v38 = vpop.f32.mrf.mxu0 }
 0x163   :  { %4034 = vst [vmem:[#allocation8_spill] sm:$0xff] %v3849_v32  ;;  %v1832_v43 = vpop.f32.mrf.mxu1  ;;  %v3854_v48 = vadd.f32 %v1828_v24, %v1648_v35  ;;  %v1652_v52 = vadd.f32 %v1651_v38, %v296_v28  ;;  %v300_v38 = vld [vmem:[%s4029_s3 + $0x1a0] sm:$0xff] }
 0x164   :  { %v1653_v57 = vpop.f32.mrf.mxu0 }
 0x165   :  { %4035 = vst [vmem:[#allocation9_spill] sm:$0xff] %v3854_v48  ;;  %v1834_v58 = vpop.f32.mrf.mxu1  ;;  %v3859_v2 = vadd.f32 %v1832_v43, %v1652_v52  ;;  %v1654_v5 = vadd.f32 %v1653_v57, %v297_v44  ;;  %v301_v57 = vld [vmem:[%s4029_s3 + $0x1a8] sm:$0xff] }
 0x166   :  { %v1655_v7 = vpop.f32.mrf.mxu0 }
 0x167   :  { %4036 = vst [vmem:[#allocation10_spill] sm:$0xff] %v3859_v2  ;;  %v1836_v14 = vpop.f32.mrf.mxu1  ;;  %v3864_v22 = vadd.f32 %v1834_v58, %v1654_v5  ;;  %v1656_v24 = vadd.f32 %v1655_v7, %v298_v60  ;;  %v302_v7 = vld [vmem:[%s4029_s3 + $0x1b0] sm:$0xff] }
 0x168   :  { %v1657_v35 = vpop.f32.mrf.mxu0 }
 0x169   :  { %4037 = vst [vmem:[#allocation11_spill] sm:$0xff] %v3864_v22  ;;  %v1838_v28 = vpop.f32.mrf.mxu1  ;;  %v3869_v48 = vadd.f32 %v1836_v14, %v1656_v24  ;;  %v1658_v43 = vadd.f32 %v1657_v35, %v299_v16  ;;  %v303_v35 = vld [vmem:[%s4029_s3 + $0x1b8] sm:$0xff] }
 0x16a   :  { %v1661_v52 = vpop.f32.mrf.mxu0 }
 0x16b   :  { %4038 = vst [vmem:[#allocation12_spill] sm:$0xff] %v3869_v48  ;;  %v1842_v44 = vpop.f32.mrf.mxu1  ;;  %v3874_v2 = vadd.f32 %v1838_v28, %v1658_v43  ;;  %v1662_v58 = vadd.f32 %v1661_v52, %v300_v38  ;;  %v2223_v43 = vlaneseq }
 0x16c   :  { %v1663_v5 = vpop.f32.mrf.mxu0 }
 0x16d   :  { %4039 = vst [vmem:[#allocation13_spill] sm:$0xff] %v3874_v2  ;;  %v1844_v60 = vpop.f32.mrf.mxu1  ;;  %v3879_v22 = vadd.f32 %v1842_v44, %v1662_v58  ;;  %v1664_v14 = vadd.f32 %v1663_v5, %v301_v57  ;;  %v304_v2 = vld [vmem:[%s4029_s3 + $0x1c0] sm:$0xff]  ;;  %v305_v5 = vld [vmem:[%s4029_s3 + $0x1c8] sm:$0xff] }
 0x16e   :  { %v1665_v24 = vpop.f32.mrf.mxu0 }
 0x16f   :  { %4040 = vst [vmem:[#allocation14_spill] sm:$0xff] %v3879_v22  ;;  %v1846_v16 = vpop.f32.mrf.mxu1  ;;  %v3884_v48 = vadd.f32 %v1844_v60, %v1664_v14  ;;  %v1666_v28 = vadd.f32 %v1665_v24, %v302_v7  ;;  %v2224_v7 = vshrl.u32 %v2223_v43, 7 }
 0x170   :  { %v1667_v38 = vpop.f32.mrf.mxu0 }
 0x171   :  { %4041 = vst [vmem:[#allocation15_spill] sm:$0xff] %v3884_v48  ;;  %v1848_v52 = vpop.f32.mrf.mxu1  ;;  %v3889_v32 = vadd.f32 %v1846_v16, %v1666_v28  ;;  %v1668_v44 = vadd.f32 %v1667_v38, %v303_v35  ;;  %v2225_v35 = vsub.s32 0, %v2224_v7 }
 0x172   :  { %v1671_v57 = vpop.f32.mrf.mxu0 }
 0x173   :  { %4042 = vst [vmem:[#allocation16_spill] sm:$0xff] %v3889_v32  ;;  %v1852_v58 = vpop.f32.mrf.mxu1  ;;  %v3894_v22 = vadd.f32 %v1848_v52, %v1668_v44  ;;  %v1672_v60 = vadd.f32 %v1671_v57, %v304_v2  ;;  %v2221_v32 = vld [vmem:[%s4028_s2] sm:$0x3]  ;;  %v2229_v52 = vsub.s32 1, %v2224_v7  ;;  %s2876_s2 = smov [#allocation2]  }
 0x174   :  { %v1673_v14 = vpop.f32.mrf.mxu0  ;;  %v3904_v57 = vrot.slane %v2221_v32, %v2225_v35  ;;  %s2412_s3 = sshll.u32 %s2876_s2, 4  ;;  %s2413_s3 = int_to_ptr.vmem [resolvable:$true] %s2412_s3 }
 0x175   :  { %v1854_v24 = vpop.f32.mrf.mxu1  ;;  %v3896_v48 = vadd.f32 %v1852_v58, %v1672_v60  ;;  %v1674_v15 = vadd.f32 %v1673_v14, %v305_v5  ;;  %s2854_s5 = scalar_lea.vmem %s2413_s3, 7424  ;;  %p2859_p1 = scmp.lt.s32.totalorder %s2413_s3, %s2413_s3 }
 0x176   :  { %v1675_v1 = vpop.f32.mrf.mxu0  ;;  %p2855_p0 = scmp.ne.s32.totalorder %s2413_s3, %s2854_s5  ;;  %p2860_p2 = scmp.lt.s32.totalorder %s2854_s5, %s2854_s5 }
 0x177   :  { %4043 = vst [vmem:[#allocation17_spill] sm:$0xff] %v3896_v48  ;;  %v1856_v49 = vpop.f32.mrf.mxu1  ;;  %v3898_v16 = vadd.f32 %v1854_v24, %v1674_v15  ;;  %v3907_v15 = vrot.slane %v2221_v32, %v2229_v52 }
 0x178   :  { %v1676_v28 = vpop.f32.mrf.mxu0  ;;  %p2861_p3 = por %p2860_p2, %p2859_p1 }
 0x179   :  { %4044 = vst [vmem:[#allocation18_spill] sm:$0xff] %v3898_v16  ;;  %v1857_v38 = vpop.f32.mrf.mxu1 }
 0x17a   :  { %v1893_v44 = vpop.f32.mrf.mxu0  ;;  %p2862_p4 = pnand %p2861_p3, %p2855_p0 }
 0x17b   :  { %v2074_v2 = vpop.f32.mrf.mxu1  ;;  %v1894_v43 = vadd.f32 %v1893_v44, %v3585_v12 }
 0x17c   :  { %v1895_v58 = vpop.f32.mrf.mxu0 }
 0x17d   :  { %v2076_v5 = vpop.f32.mrf.mxu1  ;;  %v2075_v1 = vadd.f32 %v2074_v2, %v1894_v43  ;;  %v1896_v49 = vadd.f32 %v1895_v58, %v3590_v19 }
 0x17e   :  { %v1897_v60 = vpop.f32.mrf.mxu0 }
 0x17f   :  { %v2078_v14 = vpop.f32.mrf.mxu1  ;;  %v2233_v24 = vadd.f32 %v3904_v57, %v2075_v1  ;;  %v2077_v28 = vadd.f32 %v2076_v5, %v1896_v49  ;;  %v1898_v7 = vadd.f32 %v1897_v60, %v3595_v26 }
 0x180   :  { %v1899_v38 = vpop.f32.mrf.mxu0 }
 0x181   :  { %v2080_v16 = vpop.f32.mrf.mxu1  ;;  %v2291_v48 = vmax.f32 %v2233_v24, 0.0  ;;  %v2234_v12 = vadd.f32 %v3907_v15, %v2077_v28  ;;  %v2079_v35 = vadd.f32 %v2078_v14, %v1898_v7  ;;  %v1900_v44 = vadd.f32 %v1899_v38, %v3600_v31 }
 0x182   :  { %v1903_v2 = vpop.f32.mrf.mxu0 }
 0x183   :  { %v2084_v43 = vpop.f32.mrf.mxu1  ;;  %2349 = vst [vmem:[#allocation2] sm:$0xff] %v2291_v48  ;;  %v2292_v19 = vmax.f32 %v2234_v12, 0.0  ;;  %v2235_v32 = vadd.f32 %v3904_v57, %v2079_v35  ;;  %v2081_v52 = vadd.f32 %v2080_v16, %v1900_v44  ;;  %v1904_v58 = vadd.f32 %v1903_v2, %v3618_v40 }
 0x184   :  { %v1905_v5 = vpop.f32.mrf.mxu0 }
 0x185   :  { %v2086_v1 = vpop.f32.mrf.mxu1  ;;  %2350 = vst [vmem:[#allocation2 + $0x8] sm:$0xff] %v2292_v19  ;;  %v2293_v26 = vmax.f32 %v2235_v32, 0.0  ;;  %v2236_v49 = vadd.f32 %v3907_v15, %v2081_v52  ;;  %v2085_v60 = vadd.f32 %v2084_v43, %v1904_v58  ;;  %v1906_v14 = vadd.f32 %v1905_v5, %v3623_v47 }
 0x186   :  { %v1907_v24 = vpop.f32.mrf.mxu0 }
 0x187   :  { %v2088_v31 = vpop.f32.mrf.mxu1  ;;  %2351 = vst [vmem:[#allocation2 + $0x10] sm:$0xff] %v2293_v26  ;;  %v2294_v28 = vmax.f32 %v2236_v49, 0.0  ;;  %v2237_v48 = vadd.f32 %v3904_v57, %v2085_v60  ;;  %v2087_v7 = vadd.f32 %v2086_v1, %v1906_v14  ;;  %v1908_v16 = vadd.f32 %v1907_v24, %v3628_v54 }
 0x188   :  { %v1909_v38 = vpop.f32.mrf.mxu0 }
 0x189   :  { %v2090_v40 = vpop.f32.mrf.mxu1  ;;  %2352 = vst [vmem:[#allocation2 + $0x18] sm:$0xff] %v2294_v28  ;;  %v2295_v12 = vmax.f32 %v2237_v48, 0.0  ;;  %v2238_v35 = vadd.f32 %v3907_v15, %v2087_v7  ;;  %v2089_v44 = vadd.f32 %v2088_v31, %v1908_v16  ;;  %v1910_v2 = vadd.f32 %v1909_v38, %v3633_v59 }
 0x18a   :  { %v1913_v43 = vpop.f32.mrf.mxu0 }
 0x18b   :  { %v2094_v47 = vpop.f32.mrf.mxu1  ;;  %2353 = vst [vmem:[#allocation2 + $0x20] sm:$0xff] %v2295_v12  ;;  %v2296_v19 = vmax.f32 %v2238_v35, 0.0  ;;  %v2239_v32 = vadd.f32 %v3904_v57, %v2089_v44  ;;  %v2091_v52 = vadd.f32 %v2090_v40, %v1910_v2  ;;  %v1914_v58 = vadd.f32 %v1913_v43, %v3651_v4 }
 0x18c   :  { %v1915_v5 = vpop.f32.mrf.mxu0 }
 0x18d   :  { %v2096_v54 = vpop.f32.mrf.mxu1  ;;  %2354 = vst [vmem:[#allocation2 + $0x28] sm:$0xff] %v2296_v19  ;;  %v2297_v1 = vmax.f32 %v2239_v32, 0.0  ;;  %v2240_v26 = vadd.f32 %v3907_v15, %v2091_v52  ;;  %v2095_v49 = vadd.f32 %v2094_v47, %v1914_v58  ;;  %v1916_v60 = vadd.f32 %v1915_v5, %v3656_v11 }
 0x18e   :  { %v1917_v14 = vpop.f32.mrf.mxu0 }
 0x18f   :  { %v2098_v59 = vpop.f32.mrf.mxu1  ;;  %2355 = vst [vmem:[#allocation2 + $0x30] sm:$0xff] %v2297_v1  ;;  %v2298_v24 = vmax.f32 %v2240_v26, 0.0  ;;  %v2241_v31 = vadd.f32 %v3904_v57, %v2095_v49  ;;  %v2097_v28 = vadd.f32 %v2096_v54, %v1916_v60  ;;  %v1918_v48 = vadd.f32 %v1917_v14, %v3661_v20 }
 0x190   :  { %v1919_v7 = vpop.f32.mrf.mxu0 }
 0x191   :  { %v2100_v4 = vpop.f32.mrf.mxu1  ;;  %2356 = vst [vmem:[#allocation2 + $0x38] sm:$0xff] %v2298_v24  ;;  %v2299_v16 = vmax.f32 %v2241_v31, 0.0  ;;  %v2242_v38 = vadd.f32 %v3907_v15, %v2097_v28  ;;  %v2099_v40 = vadd.f32 %v2098_v59, %v1918_v48  ;;  %v1920_v12 = vadd.f32 %v1919_v7, %v3666_v25 }
 0x192   :  { %v1923_v35 = vpop.f32.mrf.mxu0 }
 0x193   :  { %v2104_v11 = vpop.f32.mrf.mxu1  ;;  %2357 = vst [vmem:[#allocation2 + $0x40] sm:$0xff] %v2299_v16  ;;  %v2300_v44 = vmax.f32 %v2242_v38, 0.0  ;;  %v2243_v2 = vadd.f32 %v3904_v57, %v2099_v40  ;;  %v2101_v43 = vadd.f32 %v2100_v4, %v1920_v12  ;;  %v1924_v47 = vadd.f32 %v1923_v35, %v3678_v34 }
 0x194   :  { %v1925_v19 = vpop.f32.mrf.mxu0 }
 0x195   :  { %v2106_v20 = vpop.f32.mrf.mxu1  ;;  %2358 = vst [vmem:[#allocation2 + $0x48] sm:$0xff] %v2300_v44  ;;  %v2301_v32 = vmax.f32 %v2243_v2, 0.0  ;;  %v2244_v52 = vadd.f32 %v3907_v15, %v2101_v43  ;;  %v2105_v58 = vadd.f32 %v2104_v11, %v1924_v47  ;;  %v1926_v5 = vadd.f32 %v1925_v19, %v3683_v42 }
 0x196   :  { %v1927_v54 = vpop.f32.mrf.mxu0 }
 0x197   :  { %v2108_v25 = vpop.f32.mrf.mxu1  ;;  %2359 = vst [vmem:[#allocation2 + $0x50] sm:$0xff] %v2301_v32  ;;  %v2302_v1 = vmax.f32 %v2244_v52, 0.0  ;;  %v2245_v26 = vadd.f32 %v3904_v57, %v2105_v58  ;;  %v2107_v49 = vadd.f32 %v2106_v20, %v1926_v5  ;;  %v1928_v60 = vadd.f32 %v1927_v54, %v3688_v50 }
 0x198   :  { %v1929_v14 = vpop.f32.mrf.mxu0 }
 0x199   :  { %v2110_v34 = vpop.f32.mrf.mxu1  ;;  %2360 = vst [vmem:[#allocation2 + $0x58] sm:$0xff] %v2302_v1  ;;  %v2303_v59 = vmax.f32 %v2245_v26, 0.0  ;;  %v2246_v24 = vadd.f32 %v3907_v15, %v2107_v49  ;;  %v2109_v31 = vadd.f32 %v2108_v25, %v1928_v60  ;;  %v1930_v28 = vadd.f32 %v1929_v14, %v3693_v56 }
 0x19a   :  { %v1933_v48 = vpop.f32.mrf.mxu0 }
 0x19b   :  { %v2114_v42 = vpop.f32.mrf.mxu1  ;;  %2361 = vst [vmem:[#allocation2 + $0x60] sm:$0xff] %v2303_v59  ;;  %v2304_v7 = vmax.f32 %v2246_v24, 0.0  ;;  %v2247_v4 = vadd.f32 %v3904_v57, %v2109_v31  ;;  %v2111_v16 = vadd.f32 %v2110_v34, %v1930_v28  ;;  %v1934_v38 = vadd.f32 %v1933_v48, %v3699_v62 }
 0x19c   :  { %v1935_v40 = vpop.f32.mrf.mxu0 }
 0x19d   :  { %v2116_v50 = vpop.f32.mrf.mxu1  ;;  %2362 = vst [vmem:[#allocation2 + $0x68] sm:$0xff] %v2304_v7  ;;  %v2305_v12 = vmax.f32 %v2247_v4, 0.0  ;;  %v2248_v35 = vadd.f32 %v3907_v15, %v2111_v16  ;;  %v2115_v11 = vadd.f32 %v2114_v42, %v1934_v38  ;;  %v1936_v44 = vadd.f32 %v1935_v40, %v3704_v6 }
 0x19e   :  { %v1937_v2 = vpop.f32.mrf.mxu0 }
 0x19f   :  { %v2118_v56 = vpop.f32.mrf.mxu1  ;;  %2363 = vst [vmem:[#allocation2 + $0x70] sm:$0xff] %v2305_v12  ;;  %v2306_v43 = vmax.f32 %v2248_v35, 0.0  ;;  %v2249_v47 = vadd.f32 %v3904_v57, %v2115_v11  ;;  %v2117_v19 = vadd.f32 %v2116_v50, %v1936_v44  ;;  %v1938_v20 = vadd.f32 %v1937_v2, %v3709_v13 }
 0x1a0   :  { %v1939_v32 = vpop.f32.mrf.mxu0 }
 0x1a1   :  { %v2120_v62 = vpop.f32.mrf.mxu1  ;;  %2364 = vst [vmem:[#allocation2 + $0x78] sm:$0xff] %v2306_v43  ;;  %v2307_v52 = vmax.f32 %v2249_v47, 0.0  ;;  %v2250_v58 = vadd.f32 %v3907_v15, %v2117_v19  ;;  %v2119_v5 = vadd.f32 %v2118_v56, %v1938_v20  ;;  %v1940_v54 = vadd.f32 %v1939_v32, %v3714_v18 }
 0x1a2   :  { %v1943_v25 = vpop.f32.mrf.mxu0 }
 0x1a3   :  { %v2124_v6 = vpop.f32.mrf.mxu1  ;;  %2365 = vst [vmem:[#allocation2 + $0x80] sm:$0xff] %v2307_v52  ;;  %v2308_v1 = vmax.f32 %v2250_v58, 0.0  ;;  %v2251_v26 = vadd.f32 %v3904_v57, %v2119_v5  ;;  %v2121_v49 = vadd.f32 %v2120_v62, %v1940_v54  ;;  %v1944_v60 = vadd.f32 %v1943_v25, %v3719_v27 }
 0x1a4   :  { %v1945_v14 = vpop.f32.mrf.mxu0 }
 0x1a5   :  { %v2126_v13 = vpop.f32.mrf.mxu1  ;;  %2366 = vst [vmem:[#allocation2 + $0x88] sm:$0xff] %v2308_v1  ;;  %v2309_v34 = vmax.f32 %v2251_v26, 0.0  ;;  %v2252_v59 = vadd.f32 %v3907_v15, %v2121_v49  ;;  %v2125_v24 = vadd.f32 %v2124_v6, %v1944_v60  ;;  %v1946_v31 = vadd.f32 %v1945_v14, %v3724_v33 }
 0x1a6   :  { %v1947_v28 = vpop.f32.mrf.mxu0 }
 0x1a7   :  { %v2128_v18 = vpop.f32.mrf.mxu1  ;;  %2367 = vst [vmem:[#allocation2 + $0x90] sm:$0xff] %v2309_v34  ;;  %v2310_v48 = vmax.f32 %v2252_v59, 0.0  ;;  %v2253_v42 = vadd.f32 %v3904_v57, %v2125_v24  ;;  %v2127_v7 = vadd.f32 %v2126_v13, %v1946_v31  ;;  %v1948_v4 = vadd.f32 %v1947_v28, %v3729_v39 }
 0x1a8   :  { %v1949_v16 = vpop.f32.mrf.mxu0 }
 0x1a9   :  { %v2130_v27 = vpop.f32.mrf.mxu1  ;;  %2368 = vst [vmem:[#allocation2 + $0x98] sm:$0xff] %v2310_v48  ;;  %v2311_v38 = vmax.f32 %v2253_v42, 0.0  ;;  %v2254_v40 = vadd.f32 %v3907_v15, %v2127_v7  ;;  %v2129_v50 = vadd.f32 %v2128_v18, %v1948_v4  ;;  %v1950_v12 = vadd.f32 %v1949_v16, %v3734_v46 }
 0x1aa   :  { %v1953_v35 = vpop.f32.mrf.mxu0 }
 0x1ab   :  { %v2134_v33 = vpop.f32.mrf.mxu1  ;;  %2369 = vst [vmem:[#allocation2 + $0xa0] sm:$0xff] %v2311_v38  ;;  %v2312_v11 = vmax.f32 %v2254_v40, 0.0  ;;  %v2255_v44 = vadd.f32 %v3904_v57, %v2129_v50  ;;  %v2131_v2 = vadd.f32 %v2130_v27, %v1950_v12  ;;  %v1954_v56 = vadd.f32 %v1953_v35, %v3739_v53 }
 0x1ac   :  { %v1955_v43 = vpop.f32.mrf.mxu0 }
 0x1ad   :  { %v2136_v39 = vpop.f32.mrf.mxu1  ;;  %2370 = vst [vmem:[#allocation2 + $0xa8] sm:$0xff] %v2312_v11  ;;  %v2313_v47 = vmax.f32 %v2255_v44, 0.0  ;;  %v2256_v19 = vadd.f32 %v3907_v15, %v2131_v2  ;;  %v2135_v20 = vadd.f32 %v2134_v33, %v1954_v56  ;;  %v1956_v32 = vadd.f32 %v1955_v43, %v3744_v61 }
 0x1ae   :  { %v1957_v62 = vpop.f32.mrf.mxu0 }
 0x1af   :  { %v2138_v46 = vpop.f32.mrf.mxu1  ;;  %2371 = vst [vmem:[#allocation2 + $0xb0] sm:$0xff] %v2313_v47  ;;  %v2314_v52 = vmax.f32 %v2256_v19, 0.0  ;;  %v2257_v58 = vadd.f32 %v3904_v57, %v2135_v20  ;;  %v2137_v5 = vadd.f32 %v2136_v39, %v1956_v32  ;;  %v1958_v54 = vadd.f32 %v1957_v62, %v3749_v3 }
 0x1b0   :  { %v1959_v25 = vpop.f32.mrf.mxu0 }
 0x1b1   :  { %v2140_v53 = vpop.f32.mrf.mxu1  ;;  %2372 = vst [vmem:[#allocation2 + $0xb8] sm:$0xff] %v2314_v52  ;;  %v2315_v6 = vmax.f32 %v2257_v58, 0.0  ;;  %v2258_v1 = vadd.f32 %v3907_v15, %v2137_v5  ;;  %v2139_v26 = vadd.f32 %v2138_v46, %v1958_v54  ;;  %v1960_v49 = vadd.f32 %v1959_v25, %v3754_v10 }
 0x1b2   :  { %v1963_v60 = vpop.f32.mrf.mxu0 }
 0x1b3   :  { %v2144_v61 = vpop.f32.mrf.mxu1  ;;  %2373 = vst [vmem:[#allocation2 + $0xc0] sm:$0xff] %v2315_v6  ;;  %v2316_v14 = vmax.f32 %v2258_v1, 0.0  ;;  %v2259_v13 = vadd.f32 %v3904_v57, %v2139_v26  ;;  %v2141_v34 = vadd.f32 %v2140_v53, %v1960_v49  ;;  %v1964_v59 = vadd.f32 %v1963_v60, %v3759_v21 }
 0x1b4   :  { %v1965_v24 = vpop.f32.mrf.mxu0 }
 0x1b5   :  { %v2146_v3 = vpop.f32.mrf.mxu1  ;;  %2374 = vst [vmem:[#allocation2 + $0xc8] sm:$0xff] %v2316_v14  ;;  %v2317_v31 = vmax.f32 %v2259_v13, 0.0  ;;  %v2260_v28 = vadd.f32 %v3907_v15, %v2141_v34  ;;  %v2145_v18 = vadd.f32 %v2144_v61, %v1964_v59  ;;  %v1966_v48 = vadd.f32 %v1965_v24, %v3764_v29 }
 0x1b6   :  { %v1967_v42 = vpop.f32.mrf.mxu0 }
 0x1b7   :  { %v2148_v10 = vpop.f32.mrf.mxu1  ;;  %2375 = vst [vmem:[#allocation2 + $0xd0] sm:$0xff] %v2317_v31  ;;  %v2318_v7 = vmax.f32 %v2260_v28, 0.0  ;;  %v2261_v4 = vadd.f32 %v3904_v57, %v2145_v18  ;;  %v2147_v16 = vadd.f32 %v2146_v3, %v1966_v48  ;;  %v1968_v27 = vadd.f32 %v1967_v42, %v3769_v37 }
 0x1b8   :  { %v1969_v38 = vpop.f32.mrf.mxu0 }
 0x1b9   :  { %v2150_v21 = vpop.f32.mrf.mxu1  ;;  %2376 = vst [vmem:[#allocation2 + $0xd8] sm:$0xff] %v2318_v7  ;;  %v2319_v40 = vmax.f32 %v2261_v4, 0.0  ;;  %v2262_v50 = vadd.f32 %v3907_v15, %v2147_v16  ;;  %v2149_v12 = vadd.f32 %v2148_v10, %v1968_v27  ;;  %v1970_v35 = vadd.f32 %v1969_v38, %v3774_v45 }
 0x1ba   :  { %v1973_v33 = vpop.f32.mrf.mxu0 }
 0x1bb   :  { %v2154_v29 = vpop.f32.mrf.mxu1  ;;  %2377 = vst [vmem:[#allocation2 + $0xe0] sm:$0xff] %v2319_v40  ;;  %v2320_v11 = vmax.f32 %v2262_v50, 0.0  ;;  %v2263_v44 = vadd.f32 %v3904_v57, %v2149_v12  ;;  %v2151_v2 = vadd.f32 %v2150_v21, %v1970_v35  ;;  %v1974_v56 = vadd.f32 %v1973_v33, %v3779_v55 }
 0x1bc   :  { %v1975_v43 = vpop.f32.mrf.mxu0 }
 0x1bd   :  { %v2156_v37 = vpop.f32.mrf.mxu1  ;;  %2378 = vst [vmem:[#allocation2 + $0xe8] sm:$0xff] %v2320_v11  ;;  %v2321_v39 = vmax.f32 %v2263_v44, 0.0  ;;  %v2264_v47 = vadd.f32 %v3907_v15, %v2151_v2  ;;  %v2155_v19 = vadd.f32 %v2154_v29, %v1974_v56  ;;  %v1976_v20 = vadd.f32 %v1975_v43, %v3784_v0 }
 0x1be   :  { %v1977_v32 = vpop.f32.mrf.mxu0 }
 0x1bf   :  { %v2158_v45 = vpop.f32.mrf.mxu1  ;;  %2379 = vst [vmem:[#allocation2 + $0xf0] sm:$0xff] %v2321_v39  ;;  %v2322_v62 = vmax.f32 %v2264_v47, 0.0  ;;  %v2265_v46 = vadd.f32 %v3904_v57, %v2155_v19  ;;  %v2157_v52 = vadd.f32 %v2156_v37, %v1976_v20  ;;  %v1978_v58 = vadd.f32 %v1977_v32, %v3789_v8  ;;  %v4045_v32 = vld [vmem:[#allocation5_spill] sm:$0xff] }
 0x1c0   :  { %v1979_v5 = vpop.f32.mrf.mxu0 }
 0x1c1   :  { %v2160_v55 = vpop.f32.mrf.mxu1  ;;  %2380 = vst [vmem:[#allocation2 + $0xf8] sm:$0xff] %v2322_v62  ;;  %v2323_v54 = vmax.f32 %v2265_v46, 0.0  ;;  %v2266_v25 = vadd.f32 %v3907_v15, %v2157_v52  ;;  %v2159_v53 = vadd.f32 %v2158_v45, %v1978_v58  ;;  %v1980_v6 = vadd.f32 %v1979_v5, %v3794_v17  ;;  %v4046_v5 = vld [vmem:[#allocation6_spill] sm:$0xff] }
 0x1c2   :  { %v1983_v1 = vpop.f32.mrf.mxu0 }
 0x1c3   :  { %v2164_v0 = vpop.f32.mrf.mxu1  ;;  %2381 = vst [vmem:[#allocation2 + $0x100] sm:$0xff] %v2323_v54  ;;  %v2324_v26 = vmax.f32 %v2266_v25, 0.0  ;;  %v2267_v49 = vadd.f32 %v3904_v57, %v2159_v53  ;;  %v2161_v60 = vadd.f32 %v2160_v55, %v1980_v6  ;;  %v1984_v61 = vadd.f32 %v1983_v1, %v3799_v30  ;;  %v4047_v1 = vld [vmem:[#allocation7_spill] sm:$0xff] }
 0x1c4   :  { %v1985_v14 = vpop.f32.mrf.mxu0 }
 0x1c5   :  { %v2166_v8 = vpop.f32.mrf.mxu1  ;;  %2382 = vst [vmem:[#allocation2 + $0x108] sm:$0xff] %v2324_v26  ;;  %v2325_v13 = vmax.f32 %v2267_v49, 0.0  ;;  %v2268_v34 = vadd.f32 %v3907_v15, %v2161_v60  ;;  %v2165_v59 = vadd.f32 %v2164_v0, %v1984_v61  ;;  %v1986_v24 = vadd.f32 %v1985_v14, %v3804_v41 }
 0x1c6   :  { %v1987_v3 = vpop.f32.mrf.mxu0 }
 0x1c7   :  { %v2168_v17 = vpop.f32.mrf.mxu1  ;;  %2383 = vst [vmem:[#allocation2 + $0x110] sm:$0xff] %v2325_v13  ;;  %v2326_v31 = vmax.f32 %v2268_v34, 0.0  ;;  %v2269_v28 = vadd.f32 %v3904_v57, %v2165_v59  ;;  %v2167_v18 = vadd.f32 %v2166_v8, %v1986_v24  ;;  %v1988_v48 = vadd.f32 %v1987_v3, %v3809_v51  ;;  %v4048_v8 = vld [vmem:[#allocation8_spill] sm:$0xff] }
 0x1c8   :  { %v1989_v42 = vpop.f32.mrf.mxu0 }
 0x1c9   :  { %v2170_v30 = vpop.f32.mrf.mxu1  ;;  %2384 = vst [vmem:[#allocation2 + $0x118] sm:$0xff] %v2326_v31  ;;  %v2327_v10 = vmax.f32 %v2269_v28, 0.0  ;;  %v2270_v7 = vadd.f32 %v3907_v15, %v2167_v18  ;;  %v2169_v4 = vadd.f32 %v2168_v17, %v1988_v48  ;;  %v1990_v16 = vadd.f32 %v1989_v42, %v3814_v63  ;;  %v4049_v31 = vld [vmem:[#allocation9_spill] sm:$0xff] }
 0x1ca   :  { %v1993_v27 = vpop.f32.mrf.mxu0 }
 0x1cb   :  { %v2174_v41 = vpop.f32.mrf.mxu1  ;;  %2385 = vst [vmem:[#allocation2 + $0x120] sm:$0xff] %v2327_v10  ;;  %v2328_v38 = vmax.f32 %v2270_v7, 0.0  ;;  %v2271_v21 = vadd.f32 %v3904_v57, %v2169_v4  ;;  %v2171_v40 = vadd.f32 %v2170_v30, %v1990_v16  ;;  %v1994_v50 = vadd.f32 %v1993_v27, %v3819_v9  ;;  %v4050_v7 = vld [vmem:[#allocation10_spill] sm:$0xff] }
 0x1cc   :  { %v1995_v12 = vpop.f32.mrf.mxu0 }
 0x1cd   :  { %v2176_v51 = vpop.f32.mrf.mxu1  ;;  %2386 = vst [vmem:[#allocation2 + $0x128] sm:$0xff] %v2328_v38  ;;  %v2329_v35 = vmax.f32 %v2271_v21, 0.0  ;;  %v2272_v33 = vadd.f32 %v3907_v15, %v2171_v40  ;;  %v2175_v29 = vadd.f32 %v2174_v41, %v1994_v50  ;;  %v1996_v11 = vadd.f32 %v1995_v12, %v3824_v23  ;;  %v4051_v40 = vld [vmem:[#allocation11_spill] sm:$0xff] }
 0x1ce   :  { %v1997_v44 = vpop.f32.mrf.mxu0 }
 0x1cf   :  { %v2178_v63 = vpop.f32.mrf.mxu1  ;;  %2387 = vst [vmem:[#allocation2 + $0x130] sm:$0xff] %v2329_v35  ;;  %v2330_v2 = vmax.f32 %v2272_v33, 0.0  ;;  %v2273_v56 = vadd.f32 %v3904_v57, %v2175_v29  ;;  %v2177_v43 = vadd.f32 %v2176_v51, %v1996_v11  ;;  %v1998_v37 = vadd.f32 %v1997_v44, %v3829_v36  ;;  %v4052_v11 = vld [vmem:[#allocation12_spill] sm:$0xff] }
 0x1d0   :  { %v1999_v39 = vpop.f32.mrf.mxu0 }
 0x1d1   :  { %v2180_v9 = vpop.f32.mrf.mxu1  ;;  %2388 = vst [vmem:[#allocation2 + $0x138] sm:$0xff] %v2330_v2  ;;  %v2331_v47 = vmax.f32 %v2273_v56, 0.0  ;;  %v2274_v19 = vadd.f32 %v3907_v15, %v2177_v43  ;;  %v2179_v20 = vadd.f32 %v2178_v63, %v1998_v37  ;;  %v2000_v45 = vadd.f32 %v1999_v39, %v4045_v32  ;;  %v4053_v39 = vld [vmem:[#allocation13_spill] sm:$0xff] }
 0x1d2   :  { %v2003_v62 = vpop.f32.mrf.mxu0 }
 0x1d3   :  { %v2184_v23 = vpop.f32.mrf.mxu1  ;;  %2389 = vst [vmem:[#allocation2 + $0x140] sm:$0xff] %v2331_v47  ;;  %v2332_v46 = vmax.f32 %v2274_v19, 0.0  ;;  %v2275_v52 = vadd.f32 %v3904_v57, %v2179_v20  ;;  %v2181_v58 = vadd.f32 %v2180_v9, %v2000_v45  ;;  %v2004_v55 = vadd.f32 %v2003_v62, %v4046_v5  ;;  %v4054_v62 = vld [vmem:[#allocation14_spill] sm:$0xff] }
 0x1d4   :  { %v2005_v54 = vpop.f32.mrf.mxu0 }
 0x1d5   :  { %v2186_v36 = vpop.f32.mrf.mxu1  ;;  %2390 = vst [vmem:[#allocation2 + $0x148] sm:$0xff] %v2332_v46  ;;  %v2333_v25 = vmax.f32 %v2275_v52, 0.0  ;;  %v2276_v53 = vadd.f32 %v3907_v15, %v2181_v58  ;;  %v2185_v6 = vadd.f32 %v2184_v23, %v2004_v55  ;;  %v2006_v0 = vadd.f32 %v2005_v54, %v4047_v1  ;;  %v4055_v54 = vld [vmem:[#allocation15_spill] sm:$0xff] }
 0x1d6   :  { %v2007_v26 = vpop.f32.mrf.mxu0 }
 0x1d7   :  { %v2188_v49 = vpop.f32.mrf.mxu1  ;;  %2391 = vst [vmem:[#allocation2 + $0x150] sm:$0xff] %v2333_v25  ;;  %v2334_v60 = vmax.f32 %v2276_v53, 0.0  ;;  %v2277_v61 = vadd.f32 %v3904_v57, %v2185_v6  ;;  %v2187_v14 = vadd.f32 %v2186_v36, %v2006_v0  ;;  %v2008_v13 = vadd.f32 %v2007_v26, %v4048_v8  ;;  %v4056_v26 = vld [vmem:[#allocation16_spill] sm:$0xff] }
 0x1d8   :  { %v2009_v34 = vpop.f32.mrf.mxu0 }
 0x1d9   :  { %v2190_v59 = vpop.f32.mrf.mxu1  ;;  %2392 = vst [vmem:[#allocation2 + $0x158] sm:$0xff] %v2334_v60  ;;  %v2335_v24 = vmax.f32 %v2277_v61, 0.0  ;;  %v2278_v3 = vadd.f32 %v3907_v15, %v2187_v14  ;;  %v2189_v17 = vadd.f32 %v2188_v49, %v2008_v13  ;;  %v2010_v28 = vadd.f32 %v2009_v34, %v4049_v31 }
 0x1da   :  { %v2013_v18 = vpop.f32.mrf.mxu0 }
 0x1db   :  { %v2194_v48 = vpop.f32.mrf.mxu1  ;;  %2393 = vst [vmem:[#allocation2 + $0x160] sm:$0xff] %v2335_v24  ;;  %v2336_v42 = vmax.f32 %v2278_v3, 0.0  ;;  %v2279_v30 = vadd.f32 %v3904_v57, %v2189_v17  ;;  %v2191_v10 = vadd.f32 %v2190_v59, %v2010_v28  ;;  %v2014_v4 = vadd.f32 %v2013_v18, %v4050_v7  ;;  %v4057_v28 = vld [vmem:[#allocation17_spill] sm:$0xff] }
 0x1dc   :  { %v2015_v16 = vpop.f32.mrf.mxu0 }
 0x1dd   :  { %v2196_v27 = vpop.f32.mrf.mxu1  ;;  %2394 = vst [vmem:[#allocation2 + $0x168] sm:$0xff] %v2336_v42  ;;  %v2337_v41 = vmax.f32 %v2279_v30, 0.0  ;;  %v2280_v38 = vadd.f32 %v3907_v15, %v2191_v10  ;;  %v2195_v21 = vadd.f32 %v2194_v48, %v2014_v4  ;;  %v2016_v50 = vadd.f32 %v2015_v16, %v4051_v40  ;;  %v4058_v4 = vld [vmem:[#allocation18_spill] sm:$0xff] }
 0x1de   :  { %v2017_v12 = vpop.f32.mrf.mxu0 }
 0x1df   :  { %v2198_v51 = vpop.f32.mrf.mxu1  ;;  %2395 = vst [vmem:[#allocation2 + $0x170] sm:$0xff] %v2337_v41  ;;  %v2338_v35 = vmax.f32 %v2280_v38, 0.0  ;;  %v2281_v33 = vadd.f32 %v3904_v57, %v2195_v21  ;;  %v2197_v29 = vadd.f32 %v2196_v27, %v2016_v50  ;;  %v2018_v44 = vadd.f32 %v2017_v12, %v4052_v11 }
 0x1e0   :  { %v2019_v63 = vpop.f32.mrf.mxu0 }
 0x1e1   :  { %v2200_v2 = vpop.f32.mrf.mxu1  ;;  %2396 = vst [vmem:[#allocation2 + $0x178] sm:$0xff] %v2338_v35  ;;  %v2339_v56 = vmax.f32 %v2281_v33, 0.0  ;;  %v2282_v43 = vadd.f32 %v3907_v15, %v2197_v29  ;;  %v2199_v37 = vadd.f32 %v2198_v51, %v2018_v44  ;;  %v2020_v9 = vadd.f32 %v2019_v63, %v4053_v39 }
 0x1e2   :  { %v2023_v47 = vpop.f32.mrf.mxu0 }
 0x1e3   :  { %v2204_v19 = vpop.f32.mrf.mxu1  ;;  %2397 = vst [vmem:[#allocation2 + $0x180] sm:$0xff] %v2339_v56  ;;  %v2340_v20 = vmax.f32 %v2282_v43, 0.0  ;;  %v2283_v32 = vadd.f32 %v3904_v57, %v2199_v37  ;;  %v2201_v45 = vadd.f32 %v2200_v2, %v2020_v9  ;;  %v2024_v23 = vadd.f32 %v2023_v47, %v4054_v62 }
 0x1e4   :  { %v2025_v46 = vpop.f32.mrf.mxu0 }
 0x1e5   :  { %v2206_v52 = vpop.f32.mrf.mxu1  ;;  %2398 = vst [vmem:[#allocation2 + $0x188] sm:$0xff] %v2340_v20  ;;  %v2341_v58 = vmax.f32 %v2283_v32, 0.0  ;;  %v2284_v5 = vadd.f32 %v3907_v15, %v2201_v45  ;;  %v2205_v55 = vadd.f32 %v2204_v19, %v2024_v23  ;;  %v2026_v36 = vadd.f32 %v2025_v46, %v4055_v54 }
 0x1e6   :  { %v2027_v25 = vpop.f32.mrf.mxu0 }
 0x1e7   :  { %v2208_v53 = vpop.f32.mrf.mxu1  ;;  %2399 = vst [vmem:[#allocation2 + $0x190] sm:$0xff] %v2341_v58  ;;  %v2342_v6 = vmax.f32 %v2284_v5, 0.0  ;;  %v2285_v1 = vadd.f32 %v3904_v57, %v2205_v55  ;;  %v2207_v0 = vadd.f32 %v2206_v52, %v2026_v36  ;;  %v2028_v49 = vadd.f32 %v2027_v25, %v4056_v26 }
 0x1e8   :  { %v2029_v60 = vpop.f32.mrf.mxu0 }
 0x1e9   :  { %v2210_v61 = vpop.f32.mrf.mxu1  ;;  %2400 = vst [vmem:[#allocation2 + $0x198] sm:$0xff] %v2342_v6  ;;  %v2343_v14 = vmax.f32 %v2285_v1, 0.0  ;;  %v2286_v8 = vadd.f32 %v3907_v15, %v2207_v0  ;;  %v2209_v13 = vadd.f32 %v2208_v53, %v2028_v49  ;;  %v2030_v34 = vadd.f32 %v2029_v60, %v3894_v22 }
 0x1ea   :  { %v2033_v59 = vpop.f32.mrf.mxu0 }
 0x1eb   :  { %v2214_v24 = vpop.f32.mrf.mxu1  ;;  %2401 = vst [vmem:[#allocation2 + $0x1a0] sm:$0xff] %v2343_v14  ;;  %v2344_v3 = vmax.f32 %v2286_v8, 0.0  ;;  %v2287_v17 = vadd.f32 %v3904_v57, %v2209_v13  ;;  %v2211_v31 = vadd.f32 %v2210_v61, %v2030_v34  ;;  %v2034_v18 = vadd.f32 %v2033_v59, %v4057_v28 }
 0x1ec   :  { %v2035_v48 = vpop.f32.mrf.mxu0 }
 0x1ed   :  { %v2216_v42 = vpop.f32.mrf.mxu1  ;;  %2402 = vst [vmem:[#allocation2 + $0x1a8] sm:$0xff] %v2344_v3  ;;  %v2345_v30 = vmax.f32 %v2287_v17, 0.0  ;;  %v2288_v10 = vadd.f32 %v3907_v15, %v2211_v31  ;;  %v2215_v7 = vadd.f32 %v2214_v24, %v2034_v18  ;;  %v2036_v16 = vadd.f32 %v2035_v48, %v4058_v4 }
 0x1ee   :  { %v2037_v27 = vpop.f32.mrf.mxu0 }
 0x1ef   :  { %v2218_v22 = vpop.f32.mrf.mxu1  ;;  %2403 = vst [vmem:[#allocation2 + $0x1b0] sm:$0xff] %v2345_v30  ;;  %v2346_v41 = vmax.f32 %v2288_v10, 0.0  ;;  %v2289_v38 = vadd.f32 %v3904_v57, %v2215_v7  ;;  %v2217_v21 = vadd.f32 %v2216_v42, %v2036_v16 }
 0x1f0   :  { %v2038_v40 = vpop.f32.mrf.mxu0 }
 0x1f1   :  { %v2219_v50 = vpop.f32.mrf.mxu1  ;;  %2404 = vst [vmem:[#allocation2 + $0x1b8] sm:$0xff] %v2346_v41  ;;  %v2347_v12 = vmax.f32 %v2289_v38, 0.0  ;;  %v2290_v51 = vadd.f32 %v3907_v15, %v2217_v21 }
 0x1f3   :  { %2405 = vst [vmem:[#allocation2 + $0x1c0] sm:$0xff] %v2347_v12  ;;  %v2348_v35 = vmax.f32 %v2290_v51, 0.0 }
 0x1f5   :  { %2406 = vst [vmem:[#allocation2 + $0x1c8] sm:$0xff] %v2348_v35 }
 0x1f6   :  { %2865 = shalt.err (!%p2862_p4)
}
 0x1f7   :  { %s2877_s6 = smov 256   ;;  %s2878_s7 = smov 16  }
 0x1f8   :  { %2418 = dma.vmem_to_hbm [thread:$0]  %s2413_s3, 7424, %s4030_s4, [#allocation3], %s2877_s6, %s2877_s6, %s2878_s7  }
 0x1f9   :  { %2874 = dma.done.wait [#allocation3], 7424  }
 0x1fa   :  { %2875 = vsyncadd [#allocation3], 4294959872 }
 0x1fb   :  { %2422 = vsyncpa [#allocation3], 1 }

</bundles_post_ra>
